<compile_context>
chip_gen: v7x
topology: tpu7x:2x2x1
jax: 0.10.0
libtpu: 0.0.40
codegen_flags: <defaults>
</compile_context>

<pallas_src>
import functools

import jax
import jax.numpy as jnp
from jax.experimental import pallas as pl
from jax.experimental.pallas import tpu as pltpu

EPS = 1e-5
NEG_SLOPE = 0.01
F_IN, F_MID, F_OUT = 128, 128, 512


def _cdiv(a, b):
    return (a + b - 1) // b


def _round_up(a, m):
    return _cdiv(a, m) * m


def _rownorm(h):
    """Per-row (last-axis) normalization: biased variance, eps=1e-5, no affine.

    Single fused pass (sum + sum-of-squares); both cross-lane reductions issue on
    the XLU, rsqrt goes to the EUP. max(var, 0) guards the one-pass cancellation
    and keeps garbage tail rows (partial last block) finite.
    """
    inv_n = 1.0 / h.shape[-1]
    s = jnp.sum(h, axis=-1, keepdims=True)
    s2 = jnp.sum(h * h, axis=-1, keepdims=True)
    mean = s * inv_n
    var = jnp.maximum(s2 * inv_n - mean * mean, 0.0)
    return (h - mean) * jax.lax.rsqrt(var + EPS)


def _leaky_relu(h):
    return jnp.where(h > 0, h, NEG_SLOPE * h)


def global_conv_kernel(x_ref, w1_ref, b1_ref, w2_ref, b2_ref, o_ref, *,
                       precision, compute_dtype):
    # x streams in as f32; the optional bf16 narrowing happens HERE, after the
    # tile is already in VMEM, so the wrapper never pays an extra HBM pass.
    x = x_ref[...].astype(compute_dtype)

    # Linear1: (tb, 128) @ (128, 128) + (1, 128)   [MXU, f32 accumulation]
    h = jnp.dot(x, w1_ref[...], preferred_element_type=jnp.float32,
                precision=precision)
    h = h + b1_ref[...]
    h = _leaky_relu(_rownorm(h))          # instnorm1 + LeakyReLU(0.01)

    # Linear2: (tb, 128) @ (128, 512) + (1, 512)
    h = h.astype(w2_ref.dtype)            # bf16 fast path feeds the MXU in bf16
    z = jnp.dot(h, w2_ref[...], preferred_element_type=jnp.float32,
                precision=precision)
    z = z + b2_ref[...]
    z = _leaky_relu(_rownorm(z))          # instnorm2 + LeakyReLU(0.01)

    o_ref[...] = z.astype(o_ref.dtype)


def _pick_tiling(B, tb, out_dtype, use_bf16):
    """Batch tile / grid selection with a per-generation VMEM budget."""
    try:
        vmem_cap = int(pltpu.get_tpu_info().vmem_capacity_bytes)
    except Exception:
        vmem_cap = 64 << 20                       # assume the smallest (v7x per-TC)
    budget = (vmem_cap * 3) // 4                  # ~48 MiB v7x, ~96 MiB v5e/v6e

    in_b = 4                                      # x stays f32 in HBM
    w_b = 2 if use_bf16 else 4
    out_b = jnp.dtype(out_dtype).itemsize
    weight_bytes = 2 * (F_IN * F_MID + F_MID * F_OUT) * w_b + (F_MID + F_OUT) * 4
    per_row = (2 * F_IN * in_b                    # double-buffered x tile
               + 2 * F_OUT * out_b                # double-buffered out tile
               + 6 * F_OUT * 4)                   # f32 intermediates / spill headroom

    tb_vmem = max(16, ((budget - weight_bytes) // per_row) // 16 * 16)
    tb_cap = max(16, min(int(tb), tb_vmem))

    # Guarantee enough grid steps: >=2 for dual-TC sharding on v7x once B>=128,
    # >=4 for pipeline overlap once B>=512 (per-step overhead is only ~0.35us).
    if B >= 512:
        min_steps = 4
    elif B >= 128:
        min_steps = 2
    else:
        min_steps = 1

    n_tiles = max(min_steps, _cdiv(B, tb_cap))
    if n_tiles == 1:
        tb_eff = B                                # full-array block: always layout-legal
    else:
        tb_eff = _round_up(_cdiv(B, n_tiles), 16)  # 16 keeps bf16 sublane packing happy
        n_tiles = _cdiv(B, tb_eff)                 # last block may be partial (ragged)

    vmem_est = weight_bytes + per_row * tb_eff
    return tb_eff, n_tiles, vmem_est, vmem_cap


def global_conv_forward(x, w1, b1, w2, b2, *, tb=1024, use_bf16=False,
                        out_dtype=jnp.float32,
                        precision=jax.lax.Precision.DEFAULT):
    """x: (B, 128); w1: (128, 128); b1: (1, 128); w2: (128, 512); b2: (1, 512).

    Returns (B, 512) in `out_dtype`. The kernel is HBM-writeback bound, so
    out_dtype=jnp.bfloat16 is the primary fast path whenever downstream accepts
    bf16 (halves the dominant output stream); `use_bf16=True` additionally feeds
    the MXU in bf16 (cast in-kernel, f32 accumulation).

    Note: precision=DEFAULT runs the MXU in a single bf16 pass even on f32 inputs;
    pass jax.lax.Precision.HIGHEST for true-f32 matmuls (MXU-bound on v5e).
    """
    B, f_in = x.shape
    assert f_in == F_IN

    tb_eff, n_tiles, vmem_est, vmem_cap = _pick_tiling(B, tb, out_dtype, use_bf16)

    # Only the tiny, one-time weight casts live in the wrapper.
    if use_bf16:
        w1 = w1.astype(jnp.bfloat16)
        w2 = w2.astype(jnp.bfloat16)
    else:
        w1 = w1.astype(jnp.float32)
        w2 = w2.astype(jnp.float32)
    b1 = b1.astype(jnp.float32)
    b2 = b2.astype(jnp.float32)
    compute_dtype = jnp.bfloat16 if use_bf16 else jnp.float32

    cp_kwargs = dict(dimension_semantics=("parallel",))
    if vmem_est > 24 * 1024 * 1024:
        # Raise the scoped limit only when needed, and never past physical VMEM.
        cp_kwargs["vmem_limit_bytes"] = int(min(vmem_est + (8 << 20),
                                                (vmem_cap * 9) // 10))

    out = pl.pallas_call(
        functools.partial(global_conv_kernel, precision=precision,
                          compute_dtype=compute_dtype),
        out_shape=jax.ShapeDtypeStruct((B, F_OUT), out_dtype),
        grid_spec=pltpu.PrefetchScalarGridSpec(
            num_scalar_prefetch=0,
            grid=(n_tiles,),
            in_specs=[
                pl.BlockSpec((tb_eff, F_IN), lambda i: (i, 0)),      # x tile (streams)
                # Weight / bias blocks are grid-invariant: constant index_map means
                # Pallas DMAs them once and revisits the same VMEM block every step.
                pl.BlockSpec((F_IN, F_MID), lambda i: (0, 0)),       # W1
                pl.BlockSpec((1, F_MID), lambda i: (0, 0)),          # b1
                pl.BlockSpec((F_MID, F_OUT), lambda i: (0, 0)),      # W2
                pl.BlockSpec((1, F_OUT), lambda i: (0, 0)),          # b2
            ],
            out_specs=pl.BlockSpec((tb_eff, F_OUT), lambda i: (i, 0)),
        ),
        compiler_params=pltpu.CompilerParams(**cp_kwargs),
    )(x.astype(jnp.float32), w1, b1, w2, b2)

    return out


def reference_forward(x, w1, b1, w2, b2, precision=jax.lax.Precision.DEFAULT):
    """Pure-JAX ground truth (two-pass variance)."""
    def rownorm(h):
        mean = jnp.mean(h, axis=-1, keepdims=True)
        var = jnp.mean((h - mean) ** 2, axis=-1, keepdims=True)
        return (h - mean) * jax.lax.rsqrt(var + EPS)

    h = jnp.dot(x, w1, precision=precision) + b1
    h = _leaky_relu(rownorm(h))
    z = jnp.dot(h, w2, precision=precision) + b2
    return _leaky_relu(rownorm(z))


def init_params(key):
    # nn.Linear default init: U(-1/sqrt(fan_in), 1/sqrt(fan_in)); stored as (in, out).
    k1, k2, k3, k4 = jax.random.split(key, 4)
    lim = 1.0 / jnp.sqrt(128.0)
    w1 = jax.random.uniform(k1, (F_IN, F_MID), jnp.float32, -lim, lim)
    b1 = jax.random.uniform(k2, (1, F_MID), jnp.float32, -lim, lim)
    w2 = jax.random.uniform(k3, (F_MID, F_OUT), jnp.float32, -lim, lim)
    b2 = jax.random.uniform(k4, (1, F_OUT), jnp.float32, -lim, lim)
    return w1, b1, w2, b2


if __name__ == "__main__":
    key = jax.random.PRNGKey(0)
    kx, kx2, kp = jax.random.split(key, 3)

    w1, b1, w2, b2 = init_params(kp)

    # 1) small batch (B < 128): single full-array block.
    B = 96
    x = jax.random.normal(kx, (B, F_IN), jnp.float32)
    ref = reference_forward(x, w1, b1, w2, b2)
    out = jax.block_until_ready(global_conv_forward(x, w1, b1, w2, b2))
    assert out.shape == (B, F_OUT) and out.dtype == jnp.float32
    assert jnp.allclose(out, ref, atol=1e-4, rtol=1e-4), float(jnp.max(jnp.abs(out - ref)))

    # 2) forced multi-step grid (pipelined path), evenly divided tiles.
    out2 = jax.block_until_ready(global_conv_forward(x, w1, b1, w2, b2, tb=32))
    assert jnp.allclose(out2, ref, atol=1e-4, rtol=1e-4)

    # 3) ragged batch: B not a multiple of the tile -> partial last block handled
    #    in-kernel (masked tail write), no wrapper pad / slice-back HBM passes.
    out3 = jax.block_until_ready(global_conv_forward(x[:90], w1, b1, w2, b2, tb=32))
    assert out3.shape == (90, F_OUT)
    assert jnp.allclose(out3, ref[:90], atol=1e-4, rtol=1e-4)

    # 4) B >= 128: min_steps=2 guarantees a >=2-step grid (v7x dual-TC sharding),
    #    with a ragged last block under the default tile size.
    B4 = 150
    x4 = jax.random.normal(kx2, (B4, F_IN), jnp.float32)
    ref4 = reference_forward(x4, w1, b1, w2, b2)
    out4 = jax.block_until_ready(global_conv_forward(x4, w1, b1, w2, b2))
    assert out4.shape == (B4, F_OUT)
    assert jnp.allclose(out4, ref4, atol=1e-4, rtol=1e-4)

    # 5) fast path: bf16 writeback (halves the dominant HBM stream) + bf16 MXU
    #    inputs cast in-kernel; relaxed tolerance.
    out5 = jax.block_until_ready(
        global_conv_forward(x, w1, b1, w2, b2, use_bf16=True, out_dtype=jnp.bfloat16))
    assert out5.dtype == jnp.bfloat16
    assert jnp.allclose(out5.astype(jnp.float32), ref, atol=1e-1, rtol=1e-1)

    print("KERNEL_OK")
</pallas_src>

<mosaic_0001>
module attributes {stable_mosaic.version = 11 : i64} {
  func.func @global_conv_kernel(%arg0: i32, %arg1: memref<96x128xf32, #tpu.memory_space<vmem>>, %arg2: memref<128x128xf32, #tpu.memory_space<vmem>>, %arg3: memref<1x128xf32, #tpu.memory_space<vmem>>, %arg4: memref<128x512xf32, #tpu.memory_space<vmem>>, %arg5: memref<1x512xf32, #tpu.memory_space<vmem>>, %arg6: memref<96x512xf32, #tpu.memory_space<vmem>>) attributes {dimension_semantics = [#tpu.dimension_semantics<parallel>], iteration_bounds = array<i64: 1>, scalar_prefetch = 0 : i64, scratch_operands = 0 : i64, tpu.core_type = #tpu.core_type<tc>, window_params = [{transform_indices = @transform_0, window_bounds = array<i64: 96, 128>}, {pipeline_mode = #tpu.pipeline_mode<synchronous>, transform_indices = @transform_1, window_bounds = array<i64: 128, 128>}, {pipeline_mode = #tpu.pipeline_mode<synchronous>, transform_indices = @transform_2, window_bounds = array<i64: 1, 128>}, {pipeline_mode = #tpu.pipeline_mode<synchronous>, transform_indices = @transform_3, window_bounds = array<i64: 128, 512>}, {pipeline_mode = #tpu.pipeline_mode<synchronous>, transform_indices = @transform_4, window_bounds = array<i64: 1, 512>}, {transform_indices = @transform_5, window_bounds = array<i64: 96, 512>}]} {
    %c0 = arith.constant 0 : index
    %c0_0 = arith.constant 0 : index
    %0 = vector.load %arg1[%c0, %c0_0] : memref<96x128xf32, #tpu.memory_space<vmem>>, vector<96x128xf32>
    %c0_1 = arith.constant 0 : index
    %c0_2 = arith.constant 0 : index
    %1 = vector.load %arg2[%c0_1, %c0_2] : memref<128x128xf32, #tpu.memory_space<vmem>>, vector<128x128xf32>
    %cst = arith.constant dense<0.000000e+00> : vector<96x128xf32>
    %2 = tpu.matmul %0, %1, %cst {dimension_numbers = #tpu.dot_dimension_numbers<[1], [0], [0], [1], [0, 0, 1, 1], [], []>} : vector<96x128xf32>, vector<128x128xf32>, vector<96x128xf32> -> vector<96x128xf32>
    %c0_3 = arith.constant 0 : index
    %c0_4 = arith.constant 0 : index
    %3 = vector.load %arg3[%c0_3, %c0_4] : memref<1x128xf32, #tpu.memory_space<vmem>>, vector<1x128xf32>
    %4 = vector.broadcast %3 : vector<1x128xf32> to vector<96x128xf32>
    %5 = arith.addf %2, %4 : vector<96x128xf32>
    %cst_5 = arith.constant dense<0.000000e+00> : vector<96xf32>
    %6 = vector.multi_reduction <add>, %5, %cst_5 [1] : vector<96x128xf32> to vector<96xf32>
    %7 = vector.shape_cast %6 : vector<96xf32> to vector<96x1xf32>
    %8 = arith.mulf %5, %5 : vector<96x128xf32>
    %cst_6 = arith.constant dense<0.000000e+00> : vector<96xf32>
    %9 = vector.multi_reduction <add>, %8, %cst_6 [1] : vector<96x128xf32> to vector<96xf32>
    %10 = vector.shape_cast %9 : vector<96xf32> to vector<96x1xf32>
    %cst_7 = arith.constant 7.812500e-03 : f32
    %11 = vector.broadcast %cst_7 : f32 to vector<96x1xf32>
    %12 = arith.mulf %7, %11 : vector<96x1xf32>
    %cst_8 = arith.constant 7.812500e-03 : f32
    %13 = vector.broadcast %cst_8 : f32 to vector<96x1xf32>
    %14 = arith.mulf %10, %13 : vector<96x1xf32>
    %15 = arith.mulf %12, %12 : vector<96x1xf32>
    %16 = arith.subf %14, %15 : vector<96x1xf32>
    %cst_9 = arith.constant 0.000000e+00 : f32
    %17 = vector.broadcast %cst_9 : f32 to vector<96x1xf32>
    %18 = arith.maximumf %16, %17 : vector<96x1xf32>
    %19 = vector.broadcast %12 : vector<96x1xf32> to vector<96x128xf32>
    %20 = arith.subf %5, %19 : vector<96x128xf32>
    %cst_10 = arith.constant 9.99999974E-6 : f32
    %21 = vector.broadcast %cst_10 : f32 to vector<96x1xf32>
    %22 = arith.addf %18, %21 : vector<96x1xf32>
    %23 = math.rsqrt %22 : vector<96x1xf32>
    %24 = vector.broadcast %23 : vector<96x1xf32> to vector<96x128xf32>
    %25 = arith.mulf %20, %24 : vector<96x128xf32>
    %cst_11 = arith.constant 0.000000e+00 : f32
    %26 = vector.broadcast %cst_11 : f32 to vector<96x128xf32>
    %27 = arith.cmpf ogt, %25, %26 : vector<96x128xf32>
    %cst_12 = arith.constant 0.00999999977 : f32
    %28 = vector.broadcast %cst_12 : f32 to vector<96x128xf32>
    %29 = arith.mulf %28, %25 : vector<96x128xf32>
    %30 = arith.select %27, %25, %29 : vector<96x128xi1>, vector<96x128xf32>
    %c0_13 = arith.constant 0 : index
    %c0_14 = arith.constant 0 : index
    %31 = vector.load %arg4[%c0_13, %c0_14] : memref<128x512xf32, #tpu.memory_space<vmem>>, vector<128x512xf32>
    %cst_15 = arith.constant dense<0.000000e+00> : vector<96x512xf32>
    %32 = tpu.matmul %30, %31, %cst_15 {dimension_numbers = #tpu.dot_dimension_numbers<[1], [0], [0], [1], [0, 0, 1, 1], [], []>} : vector<96x128xf32>, vector<128x512xf32>, vector<96x512xf32> -> vector<96x512xf32>
    %c0_16 = arith.constant 0 : index
    %c0_17 = arith.constant 0 : index
    %33 = vector.load %arg5[%c0_16, %c0_17] : memref<1x512xf32, #tpu.memory_space<vmem>>, vector<1x512xf32>
    %34 = vector.broadcast %33 : vector<1x512xf32> to vector<96x512xf32>
    %35 = arith.addf %32, %34 : vector<96x512xf32>
    %cst_18 = arith.constant dense<0.000000e+00> : vector<96xf32>
    %36 = vector.multi_reduction <add>, %35, %cst_18 [1] : vector<96x512xf32> to vector<96xf32>
    %37 = vector.shape_cast %36 : vector<96xf32> to vector<96x1xf32>
    %38 = arith.mulf %35, %35 : vector<96x512xf32>
    %cst_19 = arith.constant dense<0.000000e+00> : vector<96xf32>
    %39 = vector.multi_reduction <add>, %38, %cst_19 [1] : vector<96x512xf32> to vector<96xf32>
    %40 = vector.shape_cast %39 : vector<96xf32> to vector<96x1xf32>
    %cst_20 = arith.constant 0.001953125 : f32
    %41 = vector.broadcast %cst_20 : f32 to vector<96x1xf32>
    %42 = arith.mulf %37, %41 : vector<96x1xf32>
    %cst_21 = arith.constant 0.001953125 : f32
    %43 = vector.broadcast %cst_21 : f32 to vector<96x1xf32>
    %44 = arith.mulf %40, %43 : vector<96x1xf32>
    %45 = arith.mulf %42, %42 : vector<96x1xf32>
    %46 = arith.subf %44, %45 : vector<96x1xf32>
    %cst_22 = arith.constant 0.000000e+00 : f32
    %47 = vector.broadcast %cst_22 : f32 to vector<96x1xf32>
    %48 = arith.maximumf %46, %47 : vector<96x1xf32>
    %49 = vector.broadcast %42 : vector<96x1xf32> to vector<96x512xf32>
    %50 = arith.subf %35, %49 : vector<96x512xf32>
    %cst_23 = arith.constant 9.99999974E-6 : f32
    %51 = vector.broadcast %cst_23 : f32 to vector<96x1xf32>
    %52 = arith.addf %48, %51 : vector<96x1xf32>
    %53 = math.rsqrt %52 : vector<96x1xf32>
    %54 = vector.broadcast %53 : vector<96x1xf32> to vector<96x512xf32>
    %55 = arith.mulf %50, %54 : vector<96x512xf32>
    %cst_24 = arith.constant 0.000000e+00 : f32
    %56 = vector.broadcast %cst_24 : f32 to vector<96x512xf32>
    %57 = arith.cmpf ogt, %55, %56 : vector<96x512xf32>
    %cst_25 = arith.constant 0.00999999977 : f32
    %58 = vector.broadcast %cst_25 : f32 to vector<96x512xf32>
    %59 = arith.mulf %58, %55 : vector<96x512xf32>
    %60 = arith.select %57, %55, %59 : vector<96x512xi1>, vector<96x512xf32>
    %c0_26 = arith.constant 0 : index
    %c0_27 = arith.constant 0 : index
    %61 = vector.load %arg6[%c0_26, %c0_27] : memref<96x512xf32, #tpu.memory_space<vmem>>, vector<96x512xf32>
    tpu.vector_store %arg6[%c0_26, %c0_27], %60 {strides = array<i32>} : memref<96x512xf32, #tpu.memory_space<vmem>>, vector<96x512xf32>,
    return
  }
  func.func @transform_0(%arg0: i32) -> (i32, i32) {
    %c0_i32 = arith.constant 0 : i32
    %c0_i32_0 = arith.constant 0 : i32
    return %arg0, %c0_i32 : i32, i32
  }
  func.func @transform_1(%arg0: i32) -> (i32, i32) {
    %c0_i32 = arith.constant 0 : i32
    %c0_i32_0 = arith.constant 0 : i32
    %c0_i32_1 = arith.constant 0 : i32
    return %c0_i32, %c0_i32_0 : i32, i32
  }
  func.func @transform_2(%arg0: i32) -> (i32, i32) {
    %c0_i32 = arith.constant 0 : i32
    %c0_i32_0 = arith.constant 0 : i32
    %c0_i32_1 = arith.constant 0 : i32
    return %c0_i32, %c0_i32_0 : i32, i32
  }
  func.func @transform_3(%arg0: i32) -> (i32, i32) {
    %c0_i32 = arith.constant 0 : i32
    %c0_i32_0 = arith.constant 0 : i32
    %c0_i32_1 = arith.constant 0 : i32
    return %c0_i32, %c0_i32_0 : i32, i32
  }
  func.func @transform_4(%arg0: i32) -> (i32, i32) {
    %c0_i32 = arith.constant 0 : i32
    %c0_i32_0 = arith.constant 0 : i32
    %c0_i32_1 = arith.constant 0 : i32
    return %c0_i32, %c0_i32_0 : i32, i32
  }
  func.func @transform_5(%arg0: i32) -> (i32, i32) {
    %c0_i32 = arith.constant 0 : i32
    %c0_i32_0 = arith.constant 0 : i32
    return %arg0, %c0_i32 : i32, i32
  }
}

</mosaic_0001>

<bundles_post_ra>
// kernel: tpu_custom_call.1
= control target key start
LH: loop header
LB: loop body
LE: loop exit
PB: predicated region body
PF: predicated region fallthrough
CT: control target
= control target key end

     0   :  { %10 = vsyncpa [#allocation3], 0  ;;  %s2481_s0 = inlined_call_operand.hbm [shape: f32[96,128], index: 0, kind: input, shape index: {}]   ;;  %s2482_s1 = inlined_call_operand.hbm [shape: f32[128,128], index: 1, kind: input, shape index: {}]   ;;  %s2483_s2 = inlined_call_operand.vmem [shape: f32[1,128], index: 2, kind: input, shape index: {}]   ;;  %s2484_s3 = inlined_call_operand.hbm [shape: f32[128,512], index: 3, kind: input, shape index: {}]   ;;  %s2485_s4 = inlined_call_operand.vmem [shape: f32[1,512], index: 4, kind: input, shape index: {}]   ;;  %s2486_s5 = inlined_call_operand.hbm [shape: f32[96,512], index: 5, kind: output, shape index: {}]  }
   0x1   :  { %11 = vsyncpa [#allocation6], 0 }
   0x2   :  { %12 = vsyncpa [#allocation4], 0  ;;  %s1686_s18 = smov [#allocation5]   ;;  %s1687_s20 = smov [#allocation2]  }
   0x3   :  { %s30_s19 = sshll.u32 %s1686_s18, 4  ;;  %s18_s21 = sshll.u32 %s1687_s20, 4  ;;  %s31_s19 = int_to_ptr.vmem [resolvable:$true] %s30_s19  ;;  %s1725_s21 = int_to_ptr.vmem [resolvable:$true] %s18_s21 }
   0x4   :  { %s1592_s24 = scalar_lea.hbm %s2482_s1, 2048 }
   0x5   :  { %p1593_p0 = scmp.ne.s32.totalorder %s2482_s1, %s1592_s24  ;;  %p1596_p1 = scmp.lt.u32.totalorder %s1592_s24, %s2482_s1 }
   0x7   :  { %p1598_p2 = pnand %p1596_p1, %p1593_p0 }
   0x9   :  { %1601 = shalt.err (!%p1598_p2)
}
   0xa   :  { %s1602_s29 = scalar_lea.vmem %s31_s19, 2048  ;;  %p1607_p4 = scmp.lt.s32.totalorder %s31_s19, %s31_s19 }
   0xb   :  { %p1603_p3 = scmp.ne.s32.totalorder %s31_s19, %s1602_s29  ;;  %p1608_p5 = scmp.lt.s32.totalorder %s1602_s29, %s1602_s29 }
   0xd   :  { %p1609_p6 = por %p1608_p5, %p1607_p4 }
   0xf   :  { %p1610_p7 = pnand %p1609_p6, %p1603_p3 }
  0x11   :  { %1613 = shalt.err (!%p1610_p7)
}
  0x12   :  { %s1688_s30 = smov 128   ;;  %s1689_s6 = smov 8  }
  0x13   :  { %36 = dma.hbm_to_vmem [thread:$0]  %s2482_s1, 2048, %s31_s19, [#allocation6], %s1688_s30, %s1688_s30, %s1689_s6  }
  0x14   :  { %s1614_s11 = scalar_lea.hbm %s2481_s0, 1536 }
  0x15   :  { %p1615_p8 = scmp.ne.s32.totalorder %s2481_s0, %s1614_s11  ;;  %p1618_p9 = scmp.lt.u32.totalorder %s1614_s11, %s2481_s0 }
  0x17   :  { %p1620_p10 = pnand %p1618_p9, %p1615_p8 }
  0x19   :  { %1623 = shalt.err (!%p1620_p10)
}
  0x1a   :  { %s1624_s16 = scalar_lea.vmem %s1725_s21, 1536  ;;  %p1629_p12 = scmp.lt.s32.totalorder %s1725_s21, %s1725_s21 }
  0x1b   :  { %p1625_p11 = scmp.ne.s32.totalorder %s1725_s21, %s1624_s16  ;;  %p1630_p13 = scmp.lt.s32.totalorder %s1624_s16, %s1624_s16 }
  0x1d   :  { %p1631_p0 = por %p1630_p13, %p1629_p12 }
  0x1f   :  { %p1632_p1 = pnand %p1631_p0, %p1625_p11 }
  0x21   :  { %1635 = shalt.err (!%p1632_p1)
}
  0x22   :  { %24 = dma.hbm_to_vmem [thread:$0]  %s2481_s0, 1536, %s1725_s21, [#allocation3], %s1688_s30, %s1688_s30, %s1689_s6  }
  0x23   :  { %s1690_s18 = smov [#allocation7]   ;;  %s1636_s23 = scalar_lea.hbm %s2484_s3, 8192 }
  0x24   :  { %s44_s19 = sshll.u32 %s1690_s18, 4  ;;  %p1637_p2 = scmp.ne.s32.totalorder %s2484_s3, %s1636_s23  ;;  %s45_s19 = int_to_ptr.vmem [resolvable:$true] %s44_s19 }
  0x25   :  { %p1640_p3 = scmp.lt.u32.totalorder %s1636_s23, %s2484_s3 }
  0x27   :  { %p1642_p4 = pnand %p1640_p3, %p1637_p2 }
  0x29   :  { %1645 = shalt.err (!%p1642_p4)
}
  0x2a   :  { %s1646_s28 = scalar_lea.vmem %s45_s19, 8192  ;;  %p1651_p6 = scmp.lt.s32.totalorder %s45_s19, %s45_s19 }
  0x2b   :  { %p1647_p5 = scmp.ne.s32.totalorder %s45_s19, %s1646_s28  ;;  %p1652_p7 = scmp.lt.s32.totalorder %s1646_s28, %s1646_s28 }
  0x2d   :  { %p1653_p8 = por %p1652_p7, %p1651_p6 }
  0x2f   :  { %p1654_p9 = pnand %p1653_p8, %p1647_p5 }
  0x31   :  { %1657 = shalt.err (!%p1654_p9)
}
  0x32   :  { %s1691_s0 = smov 512   ;;  %s1692_s21 = smov 32  }
  0x33   :  { %50 = dma.hbm_to_vmem [thread:$0]  %s2484_s3, 8192, %s45_s19, [#allocation6], %s1691_s0, %s1691_s0, %s1692_s21  }
  0x34   :  { %1680 = dma.done.wait [#allocation3], 1536  }
  0x35   :  { %1681 = vsyncadd [#allocation3], 4294965760 }
  0x36   :  { %1682 = dma.done.wait [#allocation6], 10240  }
  0x37   :  { %1683 = vsyncadd [#allocation6], 4294957056  ;;  %v74_v0 = vld [vmem:[#allocation5] sm:$0xff]  ;;  %v75_v1 = vld [vmem:[#allocation5 + $0x8] sm:$0xff] }
  0x38   :  { %v76_v2 = vld [vmem:[#allocation5 + $0x10] sm:$0xff]  ;;  %v1423_v3 = vpack.c.bf16 %v75_v1, %v74_v0  ;;  %v77_v4 = vld [vmem:[#allocation5 + $0x18] sm:$0xff]  ;;  %v78_v6 = vld [vmem:[#allocation5 + $0x20] sm:$0xff] }
  0x39   :  { %v1427_v5 = vpack.c.bf16 %v77_v4, %v76_v2  ;;  %v79_v7 = vld [vmem:[#allocation5 + $0x28] sm:$0xff]  ;;  %v62_v9 = vld [vmem:[#allocation2] sm:$0xff]  ;;  %v80_v10 = vld [vmem:[#allocation5 + $0x30] sm:$0xff] }
  0x3a   :  { %1424 = vmatprep.subr.bf16.mxu0 %v1423_v3  ;;  %v1431_v8 = vpack.c.bf16 %v79_v7, %v78_v6  ;;  %v81_v11 = vld [vmem:[#allocation5 + $0x38] sm:$0xff]  ;;  %1405 = vmatprep.mubr.f32.mxu0 %v62_v9  ;;  %v82_v13 = vld [vmem:[#allocation5 + $0x40] sm:$0xff]  ;;  %v83_v14 = vld [vmem:[#allocation5 + $0x48] sm:$0xff] }
  0x3b   :  { %1426 = vmatpush3.bf16.msra.mxu0 %v1423_v3  ;;  %v1435_v12 = vpack.c.bf16 %v81_v11, %v80_v10  ;;  %v1439_v15 = vpack.c.bf16 %v83_v14, %v82_v13  ;;  %v84_v16 = vld [vmem:[#allocation5 + $0x50] sm:$0xff]  ;;  %v85_v17 = vld [vmem:[#allocation5 + $0x58] sm:$0xff]  ;;  %v86_v19 = vld [vmem:[#allocation5 + $0x60] sm:$0xff] }
  0x3c   :  { %1428 = vmatprep.subr.bf16.mxu0 %v1427_v5  ;;  %v1443_v18 = vpack.c.bf16 %v85_v17, %v84_v16  ;;  %v87_v20 = vld [vmem:[#allocation5 + $0x68] sm:$0xff]  ;;  %v88_v22 = vld [vmem:[#allocation5 + $0x70] sm:$0xff]  ;;  %v89_v23 = vld [vmem:[#allocation5 + $0x78] sm:$0xff] }
  0x3d   :  { %v1447_v21 = vpack.c.bf16 %v87_v20, %v86_v19  ;;  %v1451_v24 = vpack.c.bf16 %v89_v23, %v88_v22  ;;  %v63_v25 = vld [vmem:[#allocation2 + $0x8] sm:$0xff]  ;;  %v64_v26 = vld [vmem:[#allocation2 + $0x10] sm:$0xff]  ;;  %v65_v27 = vld [vmem:[#allocation2 + $0x18] sm:$0xff] }
  0x3e   :  { %v66_v28 = vld [vmem:[#allocation2 + $0x20] sm:$0xff]  ;;  %v67_v29 = vld [vmem:[#allocation2 + $0x28] sm:$0xff]  ;;  %v68_v30 = vld [vmem:[#allocation2 + $0x30] sm:$0xff] }
  0x3f   :  { %1430 = vmatpush3.bf16.msra.mxu0 %v1427_v5  ;;  %v69_v31 = vld [vmem:[#allocation2 + $0x38] sm:$0xff]  ;;  %v70_v32 = vld [vmem:[#allocation2 + $0x40] sm:$0xff]  ;;  %v71_v33 = vld [vmem:[#allocation2 + $0x48] sm:$0xff] }
  0x40   :  { %1432 = vmatprep.subr.bf16.mxu0 %v1431_v8  ;;  %v72_v34 = vld [vmem:[#allocation2 + $0x50] sm:$0xff]  ;;  %v73_v35 = vld [vmem:[#allocation2 + $0x58] sm:$0xff]  ;;  %v427_v36 = vld [vmem:[#allocation7 + $0x8] sm:$0xff] }
  0x41   :  { %v431_v37 = vld [vmem:[#allocation7 + $0x28] sm:$0xff]  ;;  %v426_v38 = vld [vmem:[#allocation7] sm:$0xff]  ;;  %v429_v41 = vld [vmem:[#allocation7 + $0x18] sm:$0xff] }
  0x42   :  { %v1455_v39 = vpack.c.bf16 %v431_v37, %v427_v36  ;;  %v430_v40 = vld [vmem:[#allocation7 + $0x20] sm:$0xff]  ;;  %v433_v42 = vld [vmem:[#allocation7 + $0x38] sm:$0xff]  ;;  %v428_v45 = vld [vmem:[#allocation7 + $0x10] sm:$0xff] }
  0x43   :  { %1434 = vmatpush3.bf16.msra.mxu0 %v1431_v8  ;;  %v1457_v43 = vpack.c.bf16 %v430_v40, %v426_v38  ;;  %v1771_v44 = vpack.c.bf16 %v433_v42, %v429_v41  ;;  %v432_v46 = vld [vmem:[#allocation7 + $0x30] sm:$0xff]  ;;  %v1780_v48 = vld [vmem:[%s2483_s2] ss:$0 sm:$0xff]  ;;  %v435_v4 = vld [vmem:[#allocation7 + $0x48] sm:$0xff] }
  0x44   :  { %1436 = vmatprep.subr.bf16.mxu0 %v1435_v12  ;;  %1456 = vmatprep.subr.bf16.mxu1 %v1455_v39  ;;  %v1773_v47 = vpack.c.bf16 %v432_v46, %v428_v45  ;;  %v439_v5 = vld [vmem:[#allocation7 + $0x68] sm:$0xff]  ;;  %v437_v6 = vld [vmem:[#allocation7 + $0x58] sm:$0xff]  ;;  %v434_v9 = vld [vmem:[#allocation7 + $0x40] sm:$0xff] }
  0x45   :  { %1458 = vmatpush1.bf16.msra.mxu1 %v1457_v43  ;;  %v1459_v8 = vpack.c.bf16 %v439_v5, %v435_v4  ;;  %v438_v10 = vld [vmem:[#allocation7 + $0x60] sm:$0xff]  ;;  %v441_v11 = vld [vmem:[#allocation7 + $0x78] sm:$0xff]  ;;  %v440_v16 = vld [vmem:[#allocation7 + $0x70] sm:$0xff] }
  0x46   :  { %v1461_v13 = vpack.c.bf16 %v438_v10, %v434_v9  ;;  %v1816_v14 = vpack.c.bf16 %v441_v11, %v437_v6  ;;  %v443_v20 = vld [vmem:[#allocation7 + $0x88] sm:$0xff]  ;;  %v445_v22 = vld [vmem:[#allocation7 + $0x98] sm:$0xff]  ;;  %v450_v40 = vld [vmem:[#allocation7 + $0xc0] sm:$0xff] }
  0x47   :  { %1438 = vmatpush3.bf16.msra.mxu0 %v1435_v12  ;;  %1460 = vmatprep.subr.bf16.mxu1 %v1459_v8  ;;  %v451_v36 = vld [vmem:[#allocation7 + $0xc8] sm:$0xff]  ;;  %v453_v38 = vld [vmem:[#allocation7 + $0xd8] sm:$0xff]  ;;  %v454_v41 = vld [vmem:[#allocation7 + $0xe0] sm:$0xff] }
  0x48   :  { %1440 = vmatprep.subr.bf16.mxu0 %v1439_v15  ;;  %v455_v37 = vld [vmem:[#allocation7 + $0xe8] sm:$0xff]  ;;  %v457_v42 = vld [vmem:[#allocation7 + $0xf8] sm:$0xff]  ;;  %v1469_v43 = vpack.c.bf16 %v454_v41, %v450_v40  ;;  %v452_v46 = vld [vmem:[#allocation7 + $0xd0] sm:$0xff] }
  0x49   :  { %1462 = vmatpush1.bf16.msra.mxu1 %v1461_v13  ;;  %v1467_v39 = vpack.c.bf16 %v455_v37, %v451_v36  ;;  %v1844_v45 = vpack.c.bf16 %v457_v42, %v453_v38  ;;  %v460_v4 = vld [vmem:[#allocation7 + $0x110] sm:$0xff]  ;;  %v467_v10 = vld [vmem:[#allocation7 + $0x148] sm:$0xff]  ;;  %v478_v36 = vld [vmem:[#allocation7 + $0x1a0] sm:$0xff] }
  0x4a   :  { %v464_v5 = vld [vmem:[#allocation7 + $0x130] sm:$0xff]  ;;  %v471_v11 = vld [vmem:[#allocation7 + $0x168] sm:$0xff]  ;;  %v481_v37 = vld [vmem:[#allocation7 + $0x1b8] sm:$0xff] }
  0x4b   :  { %1442 = vmatpush3.bf16.msra.mxu0 %v1439_v15  ;;  %v436_v15 = vld [vmem:[#allocation7 + $0x50] sm:$0xff]  ;;  %v1858_v6 = vpack.c.bf16 %v464_v5, %v460_v4  ;;  %v1475_v13 = vpack.c.bf16 %v471_v11, %v467_v10  ;;  %v1693_v4 = vmov 0.0  }
  0x4c   :  { %1444 = vmatprep.subr.bf16.mxu0 %v1443_v18  ;;  %v1818_v17 = vpack.c.bf16 %v440_v16, %v436_v15  ;;  %v466_v15 = vld [vmem:[#allocation7 + $0x140] sm:$0xff]  ;;  %v480_v40 = vld [vmem:[#allocation7 + $0x1b0] sm:$0xff]  ;;  %576 = vmatprep.mubr.f32.mxu1 %v1693_v4 }
  0x4d   :  { %v470_v16 = vld [vmem:[#allocation7 + $0x160] sm:$0xff] }
  0x4f   :  { %1446 = vmatpush3.bf16.msra.mxu0 %v1443_v18 }
  0x50   :  { %1448 = vmatprep.subr.bf16.mxu0 %v1447_v21 }
  0x53   :  { %1450 = vmatpush3.bf16.msra.mxu0 %v1447_v21  ;;  %v447_v21 = vld [vmem:[#allocation7 + $0xa8] sm:$0xff] }
  0x54   :  { %1452 = vmatprep.subr.bf16.mxu0 %v1451_v24 }
  0x57   :  { %1454 = vmatpush3.bf16.msra.mxu0 %v1451_v24  ;;  %v1463_v24 = vpack.c.bf16 %v447_v21, %v443_v20  ;;  %v468_v21 = vld [vmem:[#allocation7 + $0x150] sm:$0xff] }
  0x58   :  { %1488 = vmatprep.subr.bf16.mxu0 %v1771_v44 }
  0x59   :  { %1464 = vmatprep.subr.bf16.mxu1 %v1463_v24 }
  0x5a   :  { %1406 = vmatmul.mubr.f32.vlgmr.msra.gmra.mrb[0].mxu0 %v63_v25  ;;  %v442_v25 = vld [vmem:[#allocation7 + $0x80] sm:$0xff] }
  0x5b   :  { %1408 = vmatprep.mubr.f32.mxu0 %v64_v26  ;;  %1490 = vmatpush1.bf16.msra.mxu0 %v1773_v47  ;;  %v446_v26 = vld [vmem:[#allocation7 + $0xa0] sm:$0xff] }
  0x5c   :  { %1492 = vmatprep.subr.bf16.mxu0 %v1816_v14 }
  0x5e   :  { %1409 = vmatmul.mubr.f32.gmra.mrb[2].mxu0 %v65_v27  ;;  %v449_v27 = vld [vmem:[#allocation7 + $0xb8] sm:$0xff] }
  0x5f   :  { %1411 = vmatprep.mubr.f32.mxu0 %v66_v28  ;;  %1494 = vmatpush1.bf16.msra.mxu0 %v1818_v17 }
  0x62   :  { %1412 = vmatmul.mubr.f32.gmra.mrb[4].mxu0 %v67_v29  ;;  %v1465_v29 = vpack.c.bf16 %v446_v26, %v442_v25 }
  0x63   :  { %1414 = vmatprep.mubr.f32.mxu0 %v68_v30  ;;  %v1832_v30 = vpack.c.bf16 %v449_v27, %v445_v22  ;;  %v472_v22 = vld [vmem:[#allocation7 + $0x170] sm:$0xff]  ;;  %v475_v27 = vld [vmem:[#allocation7 + $0x188] sm:$0xff] }
  0x64   :  { %1466 = vmatpush1.bf16.msra.mxu1 %v1465_v29  ;;  %v1871_v24 = vpack.c.bf16 %v472_v22, %v468_v21  ;;  %v479_v29 = vld [vmem:[#allocation7 + $0x1a8] sm:$0xff] }
  0x65   :  { %1496 = vmatprep.subr.bf16.mxu0 %v1832_v30  ;;  %1468 = vmatprep.subr.bf16.mxu1 %v1467_v39  ;;  %v476_v39 = vld [vmem:[#allocation7 + $0x190] sm:$0xff] }
  0x66   :  { %1415 = vmatmul.mubr.f32.gmra.mrb[6].mxu0 %v69_v31  ;;  %v444_v31 = vld [vmem:[#allocation7 + $0x90] sm:$0xff]  ;;  %v1884_v41 = vpack.c.bf16 %v480_v40, %v476_v39 }
  0x67   :  { %1417 = vmatprep.mubr.f32.mxu0 %v70_v32  ;;  %v448_v32 = vld [vmem:[#allocation7 + $0xb0] sm:$0xff] }
  0x68   :  { %1470 = vmatpush1.bf16.msra.mxu1 %v1469_v43 }
  0x6a   :  { %1418 = vmatmul.mubr.f32.gmra.mrb[8].mxu0 %v71_v33  ;;  %v1834_v33 = vpack.c.bf16 %v448_v32, %v444_v31  ;;  %v477_v31 = vld [vmem:[#allocation7 + $0x198] sm:$0xff]  ;;  %v1479_v32 = vpack.c.bf16 %v479_v29, %v475_v27 }
  0x6b   :  { %1420 = vmatprep.mubr.f32.mxu0 %v72_v34 }
  0x6c   :  { %1498 = vmatpush1.bf16.msra.mxu0 %v1834_v33 }
  0x6d   :  { %1500 = vmatprep.subr.bf16.mxu0 %v1844_v45 }
  0x6e   :  { %1421 = vmatmul.mubr.f32.gmra.mrb[10].mxu0 %v73_v35 }
  0x6f   :  { %713 = vmatprep.mubr.f32.mxu0 %v1693_v4 }
 0x12d   :  { %v1407_v49 = vpop.f32.mrb[0].mxu0 }
 0x12e   :  { %v1783_v50 = vadd.f32 %v1407_v49, %v1780_v48  ;;  %v163_v51 = vpop.f32.mrb[1].mxu0  ;;  %v456_v49 = vld [vmem:[#allocation7 + $0xf0] sm:$0xff] }
 0x12f   :  { %v1786_v52 = vadd.f32 %v1780_v48, %v163_v51  ;;  %v1846_v51 = vpack.c.bf16 %v456_v49, %v452_v46  ;;  %v483_v46 = vld [vmem:[#allocation7 + $0x1c8] sm:$0xff] }
 0x130   :  { %224 = vadd.xlane.f32.xlu1 %v1783_v50  ;;  %v247_v55 = vmul.f32 %v1783_v50, %v1783_v50  ;;  %v487_v49 = vld [vmem:[#allocation7 + $0x1e8] sm:$0xff] }
 0x131   :  { %222 = vadd.xlane.f32.xlu0 %v1786_v52  ;;  %v1410_v53 = vpop.f32.mrb[2].mxu0  ;;  %v246_v57 = vmul.f32 %v1786_v52, %v1786_v52  ;;  %1502 = vmatpush1.bf16.msra.mxu0 %v1846_v51 }
 0x132   :  { %v173_v54 = vpop.f32.mrb[3].mxu0  ;;  %v1798_v58 = vadd.f32 %v1410_v53, %v1780_v48 }
 0x133   :  { %v1793_v56 = vadd.f32 %v1780_v48, %v173_v54 }
 0x134   :  { %260 = vadd.xlane.f32.xlu1 %v247_v55  ;;  %v249_v63 = vmul.f32 %v1798_v58, %v1798_v58  ;;  %v459_v55 = vld [vmem:[#allocation7 + $0x108] sm:$0xff] }
 0x135   :  { %258 = vadd.xlane.f32.xlu0 %v246_v57  ;;  %v248_v59 = vmul.f32 %v1793_v56, %v1793_v56  ;;  %v1413_v60 = vpop.f32.mrb[4].mxu0  ;;  %v463_v57 = vld [vmem:[#allocation7 + $0x128] sm:$0xff] }
 0x136   :  { %v183_v61 = vpop.f32.mrb[5].mxu0  ;;  %v1809_v2 = vadd.f32 %v1413_v60, %v1780_v48  ;;  %v1471_v60 = vpack.c.bf16 %v463_v57, %v459_v55  ;;  %v1483_v55 = vpack.c.bf16 %v487_v49, %v483_v46  ;;  %v482_v57 = vld [vmem:[#allocation7 + $0x1c0] sm:$0xff] }
 0x137   :  { %v1803_v62 = vadd.f32 %v1780_v48, %v183_v61  ;;  %v458_v61 = vld [vmem:[#allocation7 + $0x100] sm:$0xff] }
 0x138   :  { %262 = vadd.xlane.f32.xlu1 %v248_v59  ;;  %v251_v19 = vmul.f32 %v1809_v2, %v1809_v2  ;;  %v461_v59 = vld [vmem:[#allocation7 + $0x118] sm:$0xff]  ;;  %1472 = vmatprep.subr.bf16.mxu1 %v1471_v60 }
 0x139   :  { %226 = vadd.xlane.f32.xlu0 %v1793_v56  ;;  %v1416_v0 = vpop.f32.mrb[6].mxu0  ;;  %v250_v3 = vmul.f32 %v1803_v62, %v1803_v62  ;;  %v489_v60 = vld [vmem:[#allocation7 + $0x1f8] sm:$0xff] }
 0x13a   :  { %v193_v1 = vpop.f32.mrb[7].mxu0  ;;  %v1837_v34 = vadd.f32 %v1416_v0, %v1780_v48  ;;  %v465_v0 = vld [vmem:[#allocation7 + $0x138] sm:$0xff] }
 0x13b   :  { %v1821_v18 = vadd.f32 %v1780_v48, %v193_v1 }
 0x13c   :  { %264 = vadd.xlane.f32.xlu1 %v249_v63  ;;  %v253_v54 = vmul.f32 %v1837_v34, %v1837_v34  ;;  %v462_v63 = vld [vmem:[#allocation7 + $0x120] sm:$0xff] }
 0x13d   :  { %228 = vadd.xlane.f32.xlu0 %v1798_v58  ;;  %v1814_v7 = vpop.f32.mrb[8].mxu0  ;;  %v252_v35 = vmul.f32 %v1821_v18, %v1821_v18  ;;  %v1473_v1 = vpack.c.bf16 %v462_v63, %v458_v61  ;;  %v484_v61 = vld [vmem:[#allocation7 + $0x1d0] sm:$0xff] }
 0x13e   :  { %v203_v12 = vpop.f32.mrb[9].mxu0  ;;  %v1862_v8 = vadd.f32 %v1814_v7, %v1780_v48  ;;  %v1477_v7 = vpack.c.bf16 %v470_v16, %v466_v15  ;;  %v488_v63 = vld [vmem:[#allocation7 + $0x1f0] sm:$0xff] }
 0x13f   :  { %v1849_v53 = vadd.f32 %v1780_v48, %v203_v12  ;;  %1474 = vmatpush1.bf16.msra.mxu1 %v1473_v1  ;;  %v469_v12 = vld [vmem:[#allocation7 + $0x158] sm:$0xff] }
 0x140   :  { %266 = vadd.xlane.f32.xlu1 %v250_v3  ;;  %v1856_v3 = vpack.c.bf16 %v465_v0, %v461_v59  ;;  %1476 = vmatprep.subr.bf16.mxu1 %v1475_v13  ;;  %v255_v26 = vmul.f32 %v1862_v8, %v1862_v8  ;;  %v486_v59 = vld [vmem:[#allocation7 + $0x1e0] sm:$0xff]  ;;  %v1897_v0 = vpack.c.bf16 %v488_v63, %v484_v61 }
 0x141   :  { %230 = vadd.xlane.f32.xlu0 %v1803_v62  ;;  %v1826_v23 = vpop.f32.mrb[10].mxu0  ;;  %v254_v9 = vmul.f32 %v1849_v53, %v1849_v53 }
 0x142   :  { %v1829_v28 = vpop.f32.mrb[11].mxu0  ;;  %1504 = vmatprep.subr.bf16.mxu0 %v1856_v3  ;;  %v1888_v42 = vadd.f32 %v1826_v23, %v1780_v48 }
 0x143   :  { %1506 = vmatpush1.bf16.msra.mxu0 %v1858_v6  ;;  %v1875_v25 = vadd.f32 %v1780_v48, %v1829_v28  ;;  %1478 = vmatpush1.bf16.msra.mxu1 %v1477_v7  ;;  %v1882_v28 = vpack.c.bf16 %v481_v37, %v477_v31  ;;  %v1485_v48 = vpack.c.bf16 %v486_v59, %v482_v57 }
 0x144   :  { %268 = vadd.xlane.f32.xlu1 %v251_v19  ;;  %v473_v19 = vld [vmem:[#allocation7 + $0x178] sm:$0xff]  ;;  %1480 = vmatprep.subr.bf16.mxu1 %v1479_v32  ;;  %v257_v1 = vmul.f32 %v1888_v42, %v1888_v42 }
 0x145   :  { %232 = vadd.xlane.f32.xlu0 %v1809_v2  ;;  %v1869_v20 = vpack.c.bf16 %v473_v19, %v469_v12  ;;  %v256_v43 = vmul.f32 %v1875_v25, %v1875_v25 }
 0x147   :  { %1508 = vmatprep.subr.bf16.mxu0 %v1869_v20 }
 0x148   :  { %270 = vadd.xlane.f32.xlu1 %v252_v35  ;;  %v474_v35 = vld [vmem:[#allocation7 + $0x180] sm:$0xff]  ;;  %1510 = vmatpush1.bf16.msra.mxu0 %v1871_v24 }
 0x149   :  { %234 = vadd.xlane.f32.xlu0 %v1821_v18  ;;  %v1481_v38 = vpack.c.bf16 %v478_v36, %v474_v35  ;;  %1512 = vmatprep.subr.bf16.mxu0 %v1882_v28 }
 0x14b   :  { %1482 = vmatpush1.bf16.msra.mxu1 %v1481_v38 }
 0x14c   :  { %272 = vadd.xlane.f32.xlu1 %v253_v54  ;;  %v485_v54 = vld [vmem:[#allocation7 + $0x1d8] sm:$0xff]  ;;  %1514 = vmatpush1.bf16.msra.mxu0 %v1884_v41 }
 0x14d   :  { %236 = vadd.xlane.f32.xlu0 %v1837_v34  ;;  %v1895_v23 = vpack.c.bf16 %v489_v60, %v485_v54  ;;  %1484 = vmatprep.subr.bf16.mxu1 %v1483_v55 }
 0x14f   :  { %1486 = vmatpush1.bf16.msra.mxu1 %v1485_v48  ;;  %1516 = vmatprep.subr.bf16.mxu0 %v1895_v23 }
 0x150   :  { %274 = vadd.xlane.f32.xlu1 %v254_v9  ;;  %1518 = vmatpush1.bf16.msra.mxu0 %v1897_v0 }
 0x151   :  { %238 = vadd.xlane.f32.xlu0 %v1849_v53  ;;  %1519 = vmatprep.subr.bf16.mxu1 %v1771_v44 }
 0x154   :  { %276 = vadd.xlane.f32.xlu1 %v255_v26 }
 0x155   :  { %240 = vadd.xlane.f32.xlu0 %v1862_v8 }
 0x158   :  { %278 = vadd.xlane.f32.xlu1 %v256_v43 }
 0x159   :  { %242 = vadd.xlane.f32.xlu0 %v1875_v25 }
 0x15c   :  { %280 = vadd.xlane.f32.xlu1 %v257_v1 }
 0x15d   :  { %244 = vadd.xlane.f32.xlu0 %v1888_v42 }
 0x1bd   :  { %v225_v5 = vpop.xlane.xlu1 %224 }
 0x1be   :  { %v283_v9 = vmul.f32 0.0078125, %v225_v5  ;;  %v223_v10 = vpop.xlane.xlu0 %222 }
 0x1bf   :  { %v282_v11 = vmul.f32 0.0078125, %v223_v10 }
 0x1c0   :  { %v307_v13 = vmul.f32 %v283_v9, %v283_v9 }
 0x1c1   :  { %v261_v12 = vpop.xlane.xlu1 %260  ;;  %v306_v19 = vmul.f32 %v282_v11, %v282_v11 }
 0x1c2   :  { %v295_v15 = vmul.f32 0.0078125, %v261_v12  ;;  %v259_v16 = vpop.xlane.xlu0 %258 }
 0x1c3   :  { %v294_v7 = vmul.f32 0.0078125, %v259_v16 }
 0x1c4   :  { %v319_v21 = vsub.f32 %v295_v15, %v307_v13 }
 0x1c5   :  { %v318_v22 = vsub.f32 %v294_v7, %v306_v19  ;;  %v263_v26 = vpop.xlane.xlu1 %262  ;;  %v343_v19 = vsub.f32 %v1783_v50, %v283_v9  ;;  %v342_v7 = vsub.f32 %v1786_v52, %v282_v11 }
 0x1c6   :  { %v331_v27 = vmax.f32 %v319_v21, 0.0  ;;  %v227_v44 = vpop.xlane.xlu0 %226  ;;  %v296_v31 = vmul.f32 0.0078125, %v263_v26 }
 0x1c7   :  { %v330_v29 = vmax.f32 %v318_v22, 0.0  ;;  %v284_v32 = vmul.f32 0.0078125, %v227_v44 }
 0x1c8   :  { %v355_v35 = vadd.f32 1e-05, %v331_v27 }
 0x1c9   :  { %v354_v36 = vadd.f32 1e-05, %v330_v29  ;;  %v308_v37 = vmul.f32 %v284_v32, %v284_v32  ;;  %v265_v38 = vpop.xlane.xlu1 %264 }
 0x1ca   :  { %1544 = vrsqrt.f32 %v355_v35  ;;  %v229_v39 = vpop.xlane.xlu0 %228  ;;  %v297_v49 = vmul.f32 0.0078125, %v265_v38 }
 0x1cb   :  { %1546 = vrsqrt.f32 %v354_v36  ;;  %v320_v40 = vsub.f32 %v296_v31, %v308_v37  ;;  %v1908_v43 = vmul.f32 0.0078125, %v229_v39 }
 0x1cd   :  { %v332_v46 = vmax.f32 %v320_v40, 0.0  ;;  %v309_v54 = vmul.f32 %v1908_v43, %v1908_v43  ;;  %v267_v55 = vpop.xlane.xlu1 %266  ;;  %v344_v40 = vsub.f32 %v1793_v56, %v284_v32 }
 0x1ce   :  { %v231_v57 = vpop.xlane.xlu0 %230  ;;  %v298_v48 = vmul.f32 0.0078125, %v267_v55 }
 0x1cf   :  { %v356_v59 = vadd.f32 1e-05, %v332_v46  ;;  %v321_v60 = vsub.f32 %v297_v49, %v309_v54  ;;  %v1912_v61 = vmul.f32 0.0078125, %v231_v57 }
 0x1d1   :  { %1548 = vrsqrt.f32 %v356_v59  ;;  %v333_v63 = vmax.f32 %v321_v60, 0.0  ;;  %v310_v1 = vmul.f32 %v1912_v61, %v1912_v61  ;;  %v269_v5 = vpop.xlane.xlu1 %268 }
 0x1d2   :  { %v233_v10 = vpop.xlane.xlu0 %232  ;;  %v299_v26 = vmul.f32 0.0078125, %v269_v5  ;;  %v345_v5 = vsub.f32 %v1798_v58, %v1908_v43 }
 0x1d3   :  { %v357_v12 = vadd.f32 1e-05, %v333_v63  ;;  %v322_v13 = vsub.f32 %v298_v48, %v310_v1  ;;  %v1916_v15 = vmul.f32 0.0078125, %v233_v10 }
 0x1d4   :  { %v1545_v16 = vpop.eup %1544 }
 0x1d5   :  { %v1547_v21 = vpop.eup %1546  ;;  %1550 = vrsqrt.f32 %v357_v12  ;;  %v334_v22 = vmax.f32 %v322_v13, 0.0  ;;  %v311_v27 = vmul.f32 %v1916_v15, %v1916_v15  ;;  %v271_v44 = vpop.xlane.xlu1 %270  ;;  %v379_v35 = vmul.f32 %v1545_v16, %v343_v19 }
 0x1d6   :  { %v235_v29 = vpop.xlane.xlu0 %234  ;;  %v378_v31 = vmul.f32 %v1547_v21, %v342_v7  ;;  %v300_v38 = vmul.f32 0.0078125, %v271_v44 }
 0x1d7   :  { %v358_v36 = vadd.f32 1e-05, %v334_v22  ;;  %v323_v37 = vsub.f32 %v299_v26, %v311_v27  ;;  %v1922_v39 = vmul.f32 0.0078125, %v235_v29  ;;  %v403_v54 = vmul.f32 0.01, %v379_v35 }
 0x1d8   :  { %vm390_vm0 = vcmp.gt.f32.partialorder %v378_v31, 0.0  ;;  %v402_v50 = vmul.f32 0.01, %v378_v31  ;;  %vm391_vm1 = vcmp.gt.f32.partialorder %v379_v35, 0.0  ;;  %v346_v26 = vsub.f32 %v1803_v62, %v1912_v61 }
 0x1d9   :  { %1552 = vrsqrt.f32 %v358_v36  ;;  %v335_v52 = vmax.f32 %v323_v37, 0.0  ;;  %v312_v9 = vmul.f32 %v1922_v39, %v1922_v39  ;;  %v273_v11 = vpop.xlane.xlu1 %272  ;;  %v415_v13 = vsel %vm391_vm1, %v379_v35, %v403_v54 }
 0x1da   :  { %v237_v46 = vpop.xlane.xlu0 %236  ;;  %v414_v49 = vsel %vm390_vm0, %v378_v31, %v402_v50  ;;  %v301_v1 = vmul.f32 0.0078125, %v273_v11  ;;  %v347_v50 = vsub.f32 %v1809_v2, %v1916_v15 }
 0x1db   :  { %v1549_v55 = vpop.eup %1548  ;;  %v359_v57 = vadd.f32 1e-05, %v335_v52  ;;  %v324_v59 = vsub.f32 %v300_v38, %v312_v9  ;;  %v1927_v60 = vmul.f32 0.0078125, %v237_v46  ;;  %577 = vmatmul.mubr.f32.vlgmr.msra.gmra.mrb[0].mxu1 %v414_v49  ;;  %714 = vmatmul.mubr.f32.vlgmr.msra.gmra.mrb[12].mxu0 %v414_v49 }
 0x1dc   :  { %v380_v48 = vmul.f32 %v1549_v55, %v344_v40  ;;  %1527 = vmatpush1.bf16.msra.mxu1 %v1773_v47  ;;  %582 = vmatprep.mubr.f32.mxu1 %v1693_v4 }
 0x1dd   :  { %1554 = vrsqrt.f32 %v359_v57  ;;  %v336_v63 = vmax.f32 %v324_v59, 0.0  ;;  %v313_v56 = vmul.f32 %v1927_v60, %v1927_v60  ;;  %v275_v32 = vpop.xlane.xlu1 %274  ;;  %719 = vmatprep.mubr.f32.mxu0 %v1693_v4  ;;  %1520 = vmatprep.subr.bf16.mxu1 %v1816_v14 }
 0x1de   :  { %v302_v10 = vmul.f32 0.0078125, %v275_v32  ;;  %v239_v12 = vpop.xlane.xlu0 %238  ;;  %v404_v47 = vmul.f32 0.01, %v380_v48  ;;  %vm392_vm2 = vcmp.gt.f32.partialorder %v380_v48, 0.0 }
 0x1df   :  { %v1551_v16 = vpop.eup %1550  ;;  %v360_v19 = vadd.f32 1e-05, %v336_v63  ;;  %v325_v7 = vsub.f32 %v301_v1, %v313_v56  ;;  %v1937_v21 = vmul.f32 0.0078125, %v239_v12  ;;  %583 = vmatmul.mubr.f32.gmra.mrb[2].mxu1 %v415_v13  ;;  %720 = vmatmul.mubr.f32.gmra.mrb[14].mxu0 %v415_v13 }
 0x1e0   :  { %v381_v22 = vmul.f32 %v1551_v16, %v345_v5  ;;  %1528 = vmatpush1.bf16.msra.mxu1 %v1818_v17  ;;  %588 = vmatprep.mubr.f32.mxu1 %v1693_v4  ;;  %v416_v44 = vsel %vm392_vm2, %v380_v48, %v404_v47 }
 0x1e1   :  { %1556 = vrsqrt.f32 %v360_v19  ;;  %v337_v14 = vmax.f32 %v325_v7, 0.0  ;;  %v314_v58 = vmul.f32 %v1937_v21, %v1937_v21  ;;  %v277_v43 = vpop.xlane.xlu1 %276  ;;  %725 = vmatprep.mubr.f32.mxu0 %v1693_v4  ;;  %1521 = vmatprep.subr.bf16.mxu1 %v1832_v30 }
 0x1e2   :  { %v241_v27 = vpop.xlane.xlu0 %240  ;;  %v405_v29 = vmul.f32 0.01, %v381_v22  ;;  %vm393_vm3 = vcmp.gt.f32.partialorder %v381_v22, 0.0  ;;  %v303_v38 = vmul.f32 0.0078125, %v277_v43 }
 0x1e3   :  { %v1553_v31 = vpop.eup %1552  ;;  %v361_v17 = vadd.f32 1e-05, %v337_v14  ;;  %v326_v35 = vsub.f32 %v302_v10, %v314_v58  ;;  %v1947_v36 = vmul.f32 0.0078125, %v241_v27  ;;  %589 = vmatmul.mubr.f32.gmra.mrb[4].mxu1 %v416_v44  ;;  %726 = vmatmul.mubr.f32.gmra.mrb[16].mxu0 %v416_v44 }
 0x1e4   :  { %v382_v37 = vmul.f32 %v1553_v31, %v346_v26  ;;  %594 = vmatprep.mubr.f32.mxu1 %v1693_v4  ;;  %731 = vmatprep.mubr.f32.mxu0 %v1693_v4  ;;  %v417_v11 = vsel %vm393_vm3, %v381_v22, %v405_v29 }
 0x1e5   :  { %1558 = vrsqrt.f32 %v361_v17  ;;  %v338_v30 = vmax.f32 %v326_v35, 0.0  ;;  %v315_v62 = vmul.f32 %v1947_v36, %v1947_v36  ;;  %v279_v61 = vpop.xlane.xlu1 %278  ;;  %1529 = vmatpush1.bf16.msra.mxu1 %v1834_v33 }
 0x1e6   :  { %v304_v52 = vmul.f32 0.0078125, %v279_v61  ;;  %v243_v9 = vpop.xlane.xlu0 %242  ;;  %v406_v40 = vmul.f32 0.01, %v382_v37  ;;  %1522 = vmatprep.subr.bf16.mxu1 %v1844_v45  ;;  %vm394_vm4 = vcmp.gt.f32.partialorder %v382_v37, 0.0  ;;  %v348_v45 = vsub.f32 %v1821_v18, %v1922_v39 }
 0x1e7   :  { %v1555_v46 = vpop.eup %1554  ;;  %v362_v49 = vadd.f32 1e-05, %v338_v30  ;;  %v327_v54 = vsub.f32 %v303_v38, %v315_v62  ;;  %v1957_v55 = vmul.f32 0.0078125, %v243_v9  ;;  %595 = vmatmul.mubr.f32.gmra.mrb[6].mxu1 %v417_v11  ;;  %732 = vmatmul.mubr.f32.gmra.mrb[18].mxu0 %v417_v11  ;;  %v490_v38 = vld [vmem:[%s2485_s4] sm:$0xf]  ;;  %s1694_s4 = smov [#allocation8]  }
 0x1e8   :  { %v383_v57 = vmul.f32 %v1555_v46, %v347_v50  ;;  %600 = vmatprep.mubr.f32.mxu1 %v1693_v4  ;;  %737 = vmatprep.mubr.f32.mxu0 %v1693_v4  ;;  %v418_v48 = vsel %vm394_vm4, %v382_v37, %v406_v40  ;;  %s1331_s8 = sshll.u32 %s1694_s4, 4  ;;  %s1332_s8 = int_to_ptr.vmem [resolvable:$true] %s1331_s8 }
 0x1e9   :  { %1560 = vrsqrt.f32 %v362_v49  ;;  %v339_v2 = vmax.f32 %v327_v54, 0.0  ;;  %v316_v33 = vmul.f32 %v1957_v55, %v1957_v55  ;;  %1530 = vmatpush1.bf16.msra.mxu1 %v1846_v51  ;;  %v281_v15 = vpop.xlane.xlu1 %280  ;;  %v352_v26 = vsub.f32 %v1875_v25, %v1957_v55  ;;  %s1658_s9 = scalar_lea.vmem %s1332_s8, 6144  ;;  %p1663_p11 = scmp.lt.s32.totalorder %s1332_s8, %s1332_s8 }
 0x1ea   :  { %v245_v59 = vpop.xlane.xlu0 %244  ;;  %v407_v63 = vmul.f32 0.01, %v383_v57  ;;  %1523 = vmatprep.subr.bf16.mxu1 %v1856_v3  ;;  %vm395_vm5 = vcmp.gt.f32.partialorder %v383_v57, 0.0  ;;  %v305_v51 = vmul.f32 0.0078125, %v281_v15  ;;  %v349_v3 = vsub.f32 %v1837_v34, %v1927_v60  ;;  %p1659_p10 = scmp.ne.s32.totalorder %s1332_s8, %s1658_s9  ;;  %p1664_p12 = scmp.lt.s32.totalorder %s1658_s9, %s1658_s9 }
 0x1eb   :  { %v1557_v1 = vpop.eup %1556  ;;  %v363_v56 = vadd.f32 1e-05, %v339_v2  ;;  %v328_v32 = vsub.f32 %v304_v52, %v316_v33  ;;  %v1967_v5 = vmul.f32 0.0078125, %v245_v59  ;;  %601 = vmatmul.mubr.f32.gmra.mrb[8].mxu1 %v418_v48  ;;  %738 = vmatmul.mubr.f32.gmra.mrb[20].mxu0 %v418_v48  ;;  %v350_v34 = vsub.f32 %v1849_v53, %v1937_v21 }
 0x1ec   :  { %v384_v10 = vmul.f32 %v1557_v1, %v348_v45  ;;  %606 = vmatprep.mubr.f32.mxu1 %v1693_v4  ;;  %743 = vmatprep.mubr.f32.mxu0 %v1693_v4  ;;  %v419_v12 = vsel %vm395_vm5, %v383_v57, %v407_v63  ;;  %v351_v53 = vsub.f32 %v1862_v8, %v1947_v36  ;;  %p1665_p13 = por %p1664_p12, %p1663_p11 }
 0x1ed   :  { %1562 = vrsqrt.f32 %v363_v56  ;;  %v340_v18 = vmax.f32 %v328_v32, 0.0  ;;  %v317_v39 = vmul.f32 %v1967_v5, %v1967_v5  ;;  %1531 = vmatpush1.bf16.msra.mxu1 %v1858_v6 }
 0x1ee   :  { %v408_v13 = vmul.f32 0.01, %v384_v10  ;;  %1524 = vmatprep.subr.bf16.mxu1 %v1869_v20  ;;  %vm396_vm6 = vcmp.gt.f32.partialorder %v384_v10, 0.0  ;;  %p1666_p0 = pnand %p1665_p13, %p1659_p10 }
 0x1ef   :  { %v1559_v47 = vpop.eup %1558  ;;  %v364_v16 = vadd.f32 1e-05, %v340_v18  ;;  %v329_v19 = vsub.f32 %v305_v51, %v317_v39  ;;  %607 = vmatmul.mubr.f32.gmra.mrb[10].mxu1 %v419_v12  ;;  %744 = vmatmul.mubr.f32.gmra.mrb[22].mxu0 %v419_v12 }
 0x1f0   :  { %v385_v7 = vmul.f32 %v1559_v47, %v349_v3  ;;  %612 = vmatprep.mubr.f32.mxu1 %v1693_v4  ;;  %749 = vmatprep.mubr.f32.mxu0 %v1693_v4  ;;  %v420_v60 = vsel %vm396_vm6, %v384_v10, %v408_v13 }
 0x1f1   :  { %1564 = vrsqrt.f32 %v364_v16  ;;  %v341_v6 = vmax.f32 %v329_v19, 0.0  ;;  %1532 = vmatpush1.bf16.msra.mxu1 %v1871_v24 }
 0x1f2   :  { %v409_v20 = vmul.f32 0.01, %v385_v7  ;;  %1525 = vmatprep.subr.bf16.mxu1 %v1882_v28  ;;  %vm397_vm7 = vcmp.gt.f32.partialorder %v385_v7, 0.0 }
 0x1f3   :  { %v1561_v22 = vpop.eup %1560  ;;  %v365_v14 = vadd.f32 1e-05, %v341_v6  ;;  %613 = vmatmul.mubr.f32.gmra.mrb[12].mxu1 %v420_v60  ;;  %750 = vmatmul.mubr.f32.gmra.mrb[24].mxu0 %v420_v60 }
 0x1f4   :  { %v386_v58 = vmul.f32 %v1561_v22, %v350_v34  ;;  %618 = vmatprep.mubr.f32.mxu1 %v1693_v4  ;;  %755 = vmatprep.mubr.f32.mxu0 %v1693_v4  ;;  %v421_v24 = vsel %vm397_vm7, %v385_v7, %v409_v20 }
 0x1f5   :  { %1566 = vrsqrt.f32 %v365_v14  ;;  %1533 = vmatpush1.bf16.msra.mxu1 %v1884_v41 }
 0x1f6   :  { %v410_v21 = vmul.f32 0.01, %v386_v58  ;;  %1526 = vmatprep.subr.bf16.mxu1 %v1895_v23  ;;  %vm398_vm8 = vcmp.gt.f32.partialorder %v386_v58, 0.0  ;;  %v353_v23 = vsub.f32 %v1888_v42, %v1967_v5  ;;  %v492_v42 = vlaneseq }
 0x1f7   :  { %v1563_v28 = vpop.eup %1562  ;;  %619 = vmatmul.mubr.f32.gmra.mrb[14].mxu1 %v421_v24  ;;  %756 = vmatmul.mubr.f32.gmra.mrb[26].mxu0 %v421_v24 }
 0x1f8   :  { %v387_v43 = vmul.f32 %v1563_v28, %v351_v53  ;;  %624 = vmatprep.mubr.f32.mxu1 %v1693_v4  ;;  %v422_v41 = vsel %vm398_vm8, %v386_v58, %v410_v21  ;;  %v493_v37 = vshrl.u32 %v492_v42, 7 }
 0x1f9   :  { %1534 = vmatpush1.bf16.msra.mxu1 %v1897_v0 }
 0x1fa   :  { %v411_v27 = vmul.f32 0.01, %v387_v43  ;;  %vm399_vm9 = vcmp.gt.f32.partialorder %v387_v43, 0.0  ;;  %v494_v30 = vsub.s32 0, %v493_v37  ;;  %v502_v62 = vsub.s32 2, %v493_v37 }
 0x1fb   :  { %v1565_v44 = vpop.eup %1564  ;;  %625 = vmatmul.mubr.f32.gmra.mrb[16].mxu1 %v422_v41  ;;  %v498_v61 = vsub.s32 1, %v493_v37  ;;  %v506_v52 = vsub.s32 3, %v493_v37 }
 0x1fc   :  { %v388_v8 = vmul.f32 %v1565_v44, %v352_v26  ;;  %630 = vmatprep.mubr.f32.mxu1 %v1693_v4  ;;  %v423_v29 = vsel %vm399_vm9, %v387_v43, %v411_v27  ;;  %v2005_v50 = vrot.slane %v490_v38, %v494_v30  ;;  %v2007_v9 = vrot.slane %v490_v38, %v502_v62 }
 0x1fd   :  { %v2009_v11 = vrot.slane %v490_v38, %v498_v61  ;;  %v2014_v54 = vrot.slane %v490_v38, %v506_v52 }
 0x1fe   :  { %v412_v31 = vmul.f32 0.01, %v388_v8  ;;  %vm400_vm10 = vcmp.gt.f32.partialorder %v388_v8, 0.0 }
 0x1ff   :  { %v1567_v17 = vpop.eup %1566  ;;  %631 = vmatmul.mubr.f32.gmra.mrb[18].mxu1 %v423_v29 }
 0x200   :  { %v389_v0 = vmul.f32 %v1567_v17, %v353_v23  ;;  %636 = vmatprep.mubr.f32.mxu1 %v1693_v4  ;;  %v424_v25 = vsel %vm400_vm10, %v388_v8, %v412_v31 }
 0x202   :  { %v413_v35 = vmul.f32 0.01, %v389_v0  ;;  %vm401_vm11 = vcmp.gt.f32.partialorder %v389_v0, 0.0 }
 0x203   :  { %637 = vmatmul.mubr.f32.gmra.mrb[20].mxu1 %v424_v25 }
 0x204   :  { %642 = vmatprep.mubr.f32.mxu1 %v1693_v4  ;;  %v425_v36 = vsel %vm401_vm11, %v389_v0, %v413_v35 }
 0x207   :  { %643 = vmatmul.mubr.f32.gmra.mrb[22].mxu1 %v425_v36 }
 0x208   :  { %761 = vmatprep.mubr.f32.mxu1 %v1693_v4 }
 0x20b   :  { %762 = vmatmul.mubr.f32.vlgmr.msra.gmra.mrb[24].mxu1 %v422_v41 }
 0x20c   :  { %767 = vmatprep.mubr.f32.mxu1 %v1693_v4 }
 0x20f   :  { %768 = vmatmul.mubr.f32.gmra.mrb[26].mxu1 %v423_v29 }
 0x210   :  { %773 = vmatprep.mubr.f32.mxu1 %v1693_v4 }
 0x213   :  { %774 = vmatmul.mubr.f32.gmra.mrb[28].mxu1 %v424_v25 }
 0x214   :  { %779 = vmatprep.mubr.f32.mxu1 %v1693_v4 }
 0x217   :  { %780 = vmatmul.mubr.f32.gmra.mrb[30].mxu1 %v425_v36 }
 0x2ae   :  { %v578_v40 = vpop.f32.mrb[0].mxu1  ;;  %v715_v46 = vpop.f32.mrb[12].mxu0 }
 0x2af   :  { %v2012_v4 = vadd.f32 %v578_v40, %v2005_v50  ;;  %v580_v49 = vpop.f32.mrb[1].mxu1  ;;  %v717_v55 = vpop.f32.mrb[13].mxu0  ;;  %v2017_v57 = vadd.f32 %v715_v46, %v2007_v9 }
 0x2b0   :  { %v2020_v2 = vadd.f32 %v580_v49, %v2009_v11  ;;  %v2029_v63 = vadd.f32 %v717_v55, %v2014_v54 }
 0x2b1   :  { %v846_v33 = vmul.f32 %v2012_v4, %v2012_v4  ;;  %v848_v5 = vmul.f32 %v2017_v57, %v2017_v57 }
 0x2b2   :  { %v786_v45 = vadd.f32 %v2020_v2, %v2012_v4  ;;  %v847_v15 = vmul.f32 %v2020_v2, %v2020_v2  ;;  %v584_v59 = vpop.f32.mrb[2].mxu1  ;;  %v721_v48 = vpop.f32.mrb[14].mxu0  ;;  %v849_v58 = vmul.f32 %v2029_v63, %v2029_v63 }
 0x2b3   :  { %v2032_v1 = vadd.f32 %v584_v59, %v2005_v50  ;;  %v586_v56 = vpop.f32.mrb[3].mxu1  ;;  %v723_v32 = vpop.f32.mrb[15].mxu0  ;;  %v2043_v3 = vadd.f32 %v721_v48, %v2007_v9 }
 0x2b4   :  { %v2037_v10 = vadd.f32 %v586_v56, %v2009_v11  ;;  %v787_v18 = vadd.f32 %v786_v45, %v2017_v57  ;;  %v894_v51 = vadd.f32 %v847_v15, %v846_v33  ;;  %v2051_v6 = vadd.f32 %v723_v32, %v2014_v54 }
 0x2b5   :  { %v850_v39 = vmul.f32 %v2032_v1, %v2032_v1  ;;  %v852_v53 = vmul.f32 %v2043_v3, %v2043_v3 }
 0x2b6   :  { %v791_v12 = vadd.f32 %v2037_v10, %v2032_v1  ;;  %v851_v13 = vmul.f32 %v2037_v10, %v2037_v10  ;;  %v590_v47 = vpop.f32.mrb[4].mxu1  ;;  %v727_v16 = vpop.f32.mrb[16].mxu0  ;;  %v788_v19 = vadd.f32 %v787_v18, %v2029_v63  ;;  %v895_v7 = vadd.f32 %v894_v51, %v848_v5 }
 0x2b7   :  { %v2054_v34 = vadd.f32 %v590_v47, %v2005_v50  ;;  %v592_v60 = vpop.f32.mrb[5].mxu1  ;;  %v729_v20 = vpop.f32.mrb[17].mxu0  ;;  %v2067_v21 = vadd.f32 %v727_v16, %v2007_v9  ;;  %v853_v17 = vmul.f32 %v2051_v6, %v2051_v6 }
 0x2b8   :  { %v2057_v22 = vadd.f32 %v592_v60, %v2009_v11  ;;  %789 = vadd.xlane.f32.xlu0 %v788_v19  ;;  %v792_v14 = vadd.f32 %v791_v12, %v2043_v3  ;;  %v899_v28 = vadd.f32 %v851_v13, %v850_v39  ;;  %v896_v8 = vadd.f32 %v895_v7, %v849_v58 }
 0x2b9   :  { %v854_v24 = vmul.f32 %v2054_v34, %v2054_v34  ;;  %v2080_v25 = vadd.f32 %v729_v20, %v2014_v54  ;;  %v856_v42 = vmul.f32 %v2067_v21, %v2067_v21 }
 0x2ba   :  { %v796_v43 = vadd.f32 %v2057_v22, %v2054_v34  ;;  %v855_v26 = vmul.f32 %v2057_v22, %v2057_v22  ;;  %v596_v41 = vpop.f32.mrb[6].mxu1  ;;  %v733_v27 = vpop.f32.mrb[18].mxu0  ;;  %v793_v44 = vadd.f32 %v792_v14, %v2051_v6  ;;  %v900_v0 = vadd.f32 %v899_v28, %v852_v53 }
 0x2bb   :  { %v2075_v23 = vadd.f32 %v596_v41, %v2005_v50  ;;  %v598_v29 = vpop.f32.mrb[7].mxu1  ;;  %v735_v31 = vpop.f32.mrb[19].mxu0  ;;  %v2091_v30 = vadd.f32 %v733_v27, %v2007_v9  ;;  %v857_v56 = vmul.f32 %v2080_v25, %v2080_v25 }
 0x2bc   :  { %v2083_v35 = vadd.f32 %v598_v29, %v2009_v11  ;;  %794 = vadd.xlane.f32.xlu1 %v793_v44  ;;  %897 = vadd.xlane.f32.xlu0 %v896_v8  ;;  %v797_v36 = vadd.f32 %v796_v43, %v2067_v21  ;;  %v904_v38 = vadd.f32 %v855_v26, %v854_v24 }
 0x2bd   :  { %v858_v37 = vmul.f32 %v2075_v23, %v2075_v23  ;;  %v901_v46 = vadd.f32 %v900_v0, %v853_v17  ;;  %v2099_v55 = vadd.f32 %v735_v31, %v2014_v54  ;;  %v860_v5 = vmul.f32 %v2091_v30, %v2091_v30 }
 0x2be   :  { %v801_v62 = vadd.f32 %v2083_v35, %v2075_v23  ;;  %v859_v61 = vmul.f32 %v2083_v35, %v2083_v35  ;;  %v602_v52 = vpop.f32.mrb[8].mxu1  ;;  %v739_v40 = vpop.f32.mrb[20].mxu0  ;;  %v798_v49 = vadd.f32 %v797_v36, %v2080_v25  ;;  %v905_v59 = vadd.f32 %v904_v38, %v856_v42 }
 0x2bf   :  { %v2102_v33 = vadd.f32 %v602_v52, %v2005_v50  ;;  %v604_v45 = vpop.f32.mrb[9].mxu1  ;;  %v741_v15 = vpop.f32.mrb[21].mxu0  ;;  %v2115_v51 = vadd.f32 %v739_v40, %v2007_v9  ;;  %v861_v58 = vmul.f32 %v2099_v55, %v2099_v55 }
 0x2c0   :  { %v2105_v48 = vadd.f32 %v604_v45, %v2009_v11  ;;  %902 = vadd.xlane.f32.xlu1 %v901_v46  ;;  %799 = vadd.xlane.f32.xlu0 %v798_v49  ;;  %v802_v32 = vadd.f32 %v801_v62, %v2091_v30  ;;  %v909_v39 = vadd.f32 %v859_v61, %v858_v37 }
 0x2c1   :  { %v862_v18 = vmul.f32 %v2102_v33, %v2102_v33  ;;  %v906_v19 = vadd.f32 %v905_v59, %v857_v56  ;;  %v2128_v24 = vadd.f32 %v741_v15, %v2014_v54  ;;  %v864_v26 = vmul.f32 %v2115_v51, %v2115_v51 }
 0x2c2   :  { %v806_v12 = vadd.f32 %v2105_v48, %v2102_v33  ;;  %v863_v13 = vmul.f32 %v2105_v48, %v2105_v48  ;;  %v608_v47 = vpop.f32.mrb[10].mxu1  ;;  %v745_v16 = vpop.f32.mrb[22].mxu0  ;;  %v803_v7 = vadd.f32 %v802_v32, %v2099_v55  ;;  %v910_v53 = vadd.f32 %v909_v39, %v860_v5 }
 0x2c3   :  { %v2123_v60 = vadd.f32 %v608_v47, %v2005_v50  ;;  %v610_v20 = vpop.f32.mrb[11].mxu1  ;;  %v747_v14 = vpop.f32.mrb[23].mxu0  ;;  %v2139_v27 = vadd.f32 %v745_v16, %v2007_v9  ;;  %v865_v40 = vmul.f32 %v2128_v24, %v2128_v24 }
 0x2c4   :  { %v2131_v28 = vadd.f32 %v610_v20, %v2009_v11  ;;  %907 = vadd.xlane.f32.xlu0 %v906_v19  ;;  %804 = vadd.xlane.f32.xlu1 %v803_v7  ;;  %v807_v43 = vadd.f32 %v806_v12, %v2115_v51  ;;  %v914_v44 = vadd.f32 %v863_v13, %v862_v18 }
 0x2c5   :  { %v866_v41 = vmul.f32 %v2123_v60, %v2123_v60  ;;  %v911_v0 = vadd.f32 %v910_v53, %v861_v58  ;;  %v2147_v42 = vadd.f32 %v747_v14, %v2014_v54  ;;  %v868_v49 = vmul.f32 %v2139_v27, %v2139_v27 }
 0x2c6   :  { %v811_v8 = vadd.f32 %v2131_v28, %v2123_v60  ;;  %v867_v29 = vmul.f32 %v2131_v28, %v2131_v28  ;;  %v614_v31 = vpop.f32.mrb[12].mxu1  ;;  %v751_v17 = vpop.f32.mrb[24].mxu0  ;;  %v808_v36 = vadd.f32 %v807_v43, %v2128_v24  ;;  %v915_v61 = vadd.f32 %v914_v44, %v864_v26 }
 0x2c7   :  { %v2150_v37 = vadd.f32 %v614_v31, %v2005_v50  ;;  %v616_v38 = vpop.f32.mrb[13].mxu1  ;;  %v753_v62 = vpop.f32.mrb[25].mxu0  ;;  %v2163_v15 = vadd.f32 %v751_v17, %v2007_v9  ;;  %v869_v7 = vmul.f32 %v2147_v42, %v2147_v42 }
 0x2c8   :  { %v2153_v52 = vadd.f32 %v616_v38, %v2009_v11  ;;  %912 = vadd.xlane.f32.xlu1 %v911_v0  ;;  %809 = vadd.xlane.f32.xlu0 %v808_v36  ;;  %v812_v46 = vadd.f32 %v811_v8, %v2139_v27  ;;  %v919_v59 = vadd.f32 %v867_v29, %v866_v41 }
 0x2c9   :  { %v870_v45 = vmul.f32 %v2150_v37, %v2150_v37  ;;  %v916_v39 = vadd.f32 %v915_v61, %v865_v40  ;;  %v2171_v13 = vadd.f32 %v753_v62, %v2014_v54  ;;  %v872_v43 = vmul.f32 %v2163_v15, %v2163_v15 }
 0x2ca   :  { %v816_v56 = vadd.f32 %v2153_v52, %v2150_v37  ;;  %v871_v32 = vmul.f32 %v2153_v52, %v2153_v52  ;;  %v620_v5 = vpop.f32.mrb[14].mxu1  ;;  %v757_v18 = vpop.f32.mrb[26].mxu0  ;;  %v813_v12 = vadd.f32 %v812_v46, %v2147_v42  ;;  %v920_v20 = vadd.f32 %v919_v59, %v868_v49 }
 0x2cb   :  { %v2174_v47 = vadd.f32 %v620_v5, %v2005_v50  ;;  %v622_v16 = vpop.f32.mrb[15].mxu1  ;;  %v759_v19 = vpop.f32.mrb[27].mxu0  ;;  %v2179_v14 = vadd.f32 %v757_v18, %v2007_v9  ;;  %v873_v38 = vmul.f32 %v2171_v13, %v2171_v13 }
 0x2cc   :  { %v2182_v58 = vadd.f32 %v622_v16, %v2009_v11  ;;  %917 = vadd.xlane.f32.xlu0 %v916_v39  ;;  %814 = vadd.xlane.f32.xlu1 %v813_v12  ;;  %v817_v53 = vadd.f32 %v816_v56, %v2163_v15  ;;  %v924_v41 = vadd.f32 %v871_v32, %v870_v45 }
 0x2cd   :  { %v874_v26 = vmul.f32 %v2174_v47, %v2174_v47  ;;  %v921_v31 = vadd.f32 %v920_v20, %v869_v7  ;;  %v2195_v0 = vadd.f32 %v759_v19, %v2014_v54  ;;  %v876_v61 = vmul.f32 %v2179_v14, %v2179_v14 }
 0x2ce   :  { %v821_v44 = vadd.f32 %v2182_v58, %v2174_v47  ;;  %v875_v8 = vmul.f32 %v2182_v58, %v2182_v58  ;;  %v626_v29 = vpop.f32.mrb[16].mxu1  ;;  %v818_v17 = vadd.f32 %v817_v53, %v2171_v13  ;;  %v925_v62 = vadd.f32 %v924_v41, %v872_v43 }
 0x2cf   :  { %v628_v36 = vpop.f32.mrb[17].mxu1  ;;  %v877_v5 = vmul.f32 %v2195_v0, %v2195_v0  ;;  %v2206_v16 = vadd.f32 %v626_v29, %v2005_v50 }
 0x2d0   :  { %922 = vadd.xlane.f32.xlu1 %v921_v31  ;;  %819 = vadd.xlane.f32.xlu0 %v818_v17  ;;  %v822_v40 = vadd.f32 %v821_v44, %v2179_v14  ;;  %v929_v46 = vadd.f32 %v875_v8, %v874_v26  ;;  %v926_v45 = vadd.f32 %v925_v62, %v873_v38 }
 0x2d1   :  { %v2209_v19 = vadd.f32 %v628_v36, %v2009_v11  ;;  %v878_v53 = vmul.f32 %v2206_v16, %v2206_v16 }
 0x2d2   :  { %v632_v49 = vpop.f32.mrb[18].mxu1  ;;  %v823_v59 = vadd.f32 %v822_v40, %v2195_v0  ;;  %v930_v56 = vadd.f32 %v929_v46, %v876_v61 }
 0x2d3   :  { %v634_v32 = vpop.f32.mrb[19].mxu1  ;;  %v879_v43 = vmul.f32 %v2209_v19, %v2209_v19  ;;  %v2216_v26 = vadd.f32 %v632_v49, %v2005_v50  ;;  %v826_v8 = vadd.f32 %v2209_v19, %v2206_v16 }
 0x2d4   :  { %927 = vadd.xlane.f32.xlu0 %v926_v45  ;;  %824 = vadd.xlane.f32.xlu1 %v823_v59  ;;  %v931_v39 = vadd.f32 %v930_v56, %v877_v5  ;;  %v2219_v41 = vadd.f32 %v634_v32, %v2009_v11 }
 0x2d5   :  { %v934_v62 = vadd.f32 %v879_v43, %v878_v53  ;;  %v882_v61 = vmul.f32 %v2216_v26, %v2216_v26 }
 0x2d6   :  { %v638_v18 = vpop.f32.mrb[20].mxu1  ;;  %2495 = vst [vmem:[#allocation12_spill] sm:$0xff] %v2219_v41  ;;  %v883_v40 = vmul.f32 %v2219_v41, %v2219_v41  ;;  %v831_v45 = vadd.f32 %v2219_v41, %v2216_v26 }
 0x2d7   :  { %v640_v12 = vpop.f32.mrb[21].mxu1  ;;  %v2227_v17 = vadd.f32 %v638_v18, %v2005_v50 }
 0x2d8   :  { %932 = vadd.xlane.f32.xlu1 %v931_v39  ;;  %v2230_v36 = vadd.f32 %v640_v12, %v2009_v11 }
 0x2d9   :  { %v886_v12 = vmul.f32 %v2227_v17, %v2227_v17 }
 0x2da   :  { %v644_v7 = vpop.f32.mrb[22].mxu1  ;;  %2496 = vst [vmem:[#allocation13_spill] sm:$0xff] %v2230_v36  ;;  %v887_v53 = vmul.f32 %v2230_v36, %v2230_v36 }
 0x2db   :  { %v646_v20 = vpop.f32.mrb[23].mxu1  ;;  %v2255_v43 = vadd.f32 %v644_v7, %v2005_v50 }
 0x2dd   :  { %2497 = vst [vmem:[#allocation14_spill] sm:$0xff] %v2255_v43 }
 0x2de   :  { %v763_v44 = vpop.f32.mrb[24].mxu1 }
 0x2df   :  { %v2224_v29 = vadd.f32 %v763_v44, %v2007_v9  ;;  %v765_v31 = vpop.f32.mrb[25].mxu1 }
 0x2e0   :  { %v2233_v38 = vadd.f32 %v765_v31, %v2014_v54 }
 0x2e1   :  { %v880_v46 = vmul.f32 %v2224_v29, %v2224_v29  ;;  %v827_v49 = vadd.f32 %v826_v8, %v2224_v29  ;;  %v2261_v8 = vadd.f32 %v646_v20, %v2009_v11 }
 0x2e2   :  { %v769_v59 = vpop.f32.mrb[26].mxu1  ;;  %v881_v18 = vmul.f32 %v2233_v38, %v2233_v38 }
 0x2e3   :  { %v2245_v56 = vadd.f32 %v769_v59, %v2007_v9  ;;  %v771_v32 = vpop.f32.mrb[27].mxu1  ;;  %v828_v5 = vadd.f32 %v827_v49, %v2233_v38  ;;  %v935_v39 = vadd.f32 %v934_v62, %v880_v46  ;;  %2498 = vst [vmem:[#allocation15_spill] sm:$0xff] %v2261_v8  ;;  %v939_v46 = vadd.f32 %v883_v40, %v882_v61 }
 0x2e4   :  { %v2258_v44 = vadd.f32 %v771_v32, %v2014_v54  ;;  %v836_v49 = vadd.f32 %v2230_v36, %v2227_v17  ;;  %v944_v40 = vadd.f32 %v887_v53, %v886_v12 }
 0x2e5   :  { %v884_v31 = vmul.f32 %v2245_v56, %v2245_v56  ;;  %829 = vadd.xlane.f32.xlu0 %v828_v5  ;;  %v832_v62 = vadd.f32 %v831_v45, %v2245_v56  ;;  %v936_v20 = vadd.f32 %v935_v39, %v881_v18  ;;  %v890_v5 = vmul.f32 %v2255_v43, %v2255_v43 }
 0x2e6   :  { %v775_v59 = vpop.f32.mrb[28].mxu1  ;;  %v885_v50 = vmul.f32 %v2258_v44, %v2258_v44  ;;  %v891_v45 = vmul.f32 %v2261_v8, %v2261_v8  ;;  %v841_v18 = vadd.f32 %v2261_v8, %v2255_v43 }
 0x2e7   :  { %v2271_v7 = vadd.f32 %v775_v59, %v2007_v9  ;;  %v777_v32 = vpop.f32.mrb[29].mxu1  ;;  %v833_v11 = vadd.f32 %v832_v62, %v2258_v44  ;;  %v940_v41 = vadd.f32 %v939_v46, %v884_v31 }
 0x2e8   :  { %v2277_v61 = vadd.f32 %v777_v32, %v2014_v54 }
 0x2e9   :  { %2499 = vst [vmem:[#allocation16_spill] sm:$0xff] %v2271_v7  ;;  %v888_v36 = vmul.f32 %v2271_v7, %v2271_v7  ;;  %834 = vadd.xlane.f32.xlu1 %v833_v11  ;;  %937 = vadd.xlane.f32.xlu0 %v936_v20  ;;  %v837_v59 = vadd.f32 %v836_v49, %v2271_v7 }
 0x2ea   :  { %2500 = vst [vmem:[#allocation17_spill] sm:$0xff] %v2277_v61  ;;  %v781_v39 = vpop.f32.mrb[30].mxu1  ;;  %v941_v31 = vadd.f32 %v940_v41, %v885_v50  ;;  %v889_v53 = vmul.f32 %v2277_v61, %v2277_v61  ;;  %v949_v50 = vadd.f32 %v891_v45, %v890_v5 }
 0x2eb   :  { %v2287_v62 = vadd.f32 %v781_v39, %v2007_v9  ;;  %v783_v46 = vpop.f32.mrb[31].mxu1  ;;  %v838_v12 = vadd.f32 %v837_v59, %v2277_v61  ;;  %v945_v32 = vadd.f32 %v944_v40, %v888_v36 }
 0x2ec   :  { %v2293_v11 = vadd.f32 %v783_v46, %v2014_v54 }
 0x2ed   :  { %2501 = vst [vmem:[#allocation18_spill] sm:$0xff] %v2287_v62  ;;  %v892_v49 = vmul.f32 %v2287_v62, %v2287_v62  ;;  %942 = vadd.xlane.f32.xlu1 %v941_v31  ;;  %839 = vadd.xlane.f32.xlu0 %v838_v12  ;;  %v842_v41 = vadd.f32 %v841_v18, %v2287_v62 }
 0x2ee   :  { %2502 = vst [vmem:[#allocation19_spill] sm:$0xff] %v2293_v11  ;;  %v946_v9 = vadd.f32 %v945_v32, %v889_v53  ;;  %v893_v59 = vmul.f32 %v2293_v11, %v2293_v11 }
 0x2ef   :  { %v843_v20 = vadd.f32 %v842_v41, %v2293_v11  ;;  %v950_v39 = vadd.f32 %v949_v50, %v892_v49 }
 0x2f1   :  { %947 = vadd.xlane.f32.xlu0 %v946_v9  ;;  %844 = vadd.xlane.f32.xlu1 %v843_v20  ;;  %v951_v36 = vadd.f32 %v950_v39, %v893_v59 }
 0x2f5   :  { %952 = vadd.xlane.f32.xlu1 %v951_v36 }
 0x345   :  { %v790_v54 = vpop.xlane.xlu0 %789 }
 0x346   :  { %v2301_v40 = vmul.f32 0.001953125, %v790_v54 }
 0x348   :  { %v978_v5 = vmul.f32 %v2301_v40, %v2301_v40 }
 0x349   :  { %v795_v46 = vpop.xlane.xlu1 %794  ;;  %v898_v31 = vpop.xlane.xlu0 %897 }
 0x34a   :  { %v2303_v12 = vmul.f32 0.001953125, %v795_v46  ;;  %v966_v18 = vmul.f32 0.001953125, %v898_v31 }
 0x34c   :  { %v990_v45 = vsub.f32 %v966_v18, %v978_v5  ;;  %v979_v49 = vmul.f32 %v2303_v12, %v2303_v12 }
 0x34d   :  { %v903_v53 = vpop.xlane.xlu1 %902  ;;  %v800_v32 = vpop.xlane.xlu0 %799 }
 0x34e   :  { %v967_v41 = vmul.f32 0.001953125, %v903_v53  ;;  %v1002_v50 = vmax.f32 %v990_v45, 0.0  ;;  %v2309_v9 = vmul.f32 0.001953125, %v800_v32  ;;  %v1014_v32 = vsub.f32 %v2012_v4, %v2301_v40 }
 0x34f   :  { %v1020_v4 = vsub.f32 %v2043_v3, %v2303_v12 }
 0x350   :  { %v991_v20 = vsub.f32 %v967_v41, %v979_v49  ;;  %v1062_v59 = vadd.f32 1e-05, %v1002_v50  ;;  %v980_v18 = vmul.f32 %v2309_v9, %v2309_v9  ;;  %v1015_v49 = vsub.f32 %v2020_v2, %v2301_v40 }
 0x351   :  { %v805_v39 = vpop.xlane.xlu1 %804  ;;  %v908_v36 = vpop.xlane.xlu0 %907  ;;  %v1021_v2 = vsub.f32 %v2051_v6, %v2303_v12  ;;  %v1025_v6 = vsub.f32 %v2080_v25, %v2309_v9 }
 0x352   :  { %v1003_v54 = vmax.f32 %v991_v20, 0.0  ;;  %v2311_v46 = vmul.f32 0.001953125, %v805_v39  ;;  %v968_v31 = vmul.f32 0.001953125, %v908_v36  ;;  %1568 = vrsqrt.f32 %v1062_v59 }
 0x353   :  { %v1016_v20 = vsub.f32 %v2017_v57, %v2301_v40  ;;  %v1017_v59 = vsub.f32 %v2029_v63, %v2301_v40  ;;  %v1018_v39 = vsub.f32 %v2032_v1, %v2303_v12  ;;  %v1022_v57 = vsub.f32 %v2054_v34, %v2309_v9 }
 0x354   :  { %v1063_v5 = vadd.f32 1e-05, %v1003_v54  ;;  %v992_v11 = vsub.f32 %v968_v31, %v980_v18  ;;  %v981_v45 = vmul.f32 %v2311_v46, %v2311_v46  ;;  %v1023_v31 = vsub.f32 %v2057_v22, %v2309_v9 }
 0x355   :  { %v913_v62 = vpop.xlane.xlu1 %912  ;;  %v810_v8 = vpop.xlane.xlu0 %809 }
 0x356   :  { %1570 = vrsqrt.f32 %v1063_v5  ;;  %v969_v53 = vmul.f32 0.001953125, %v913_v62  ;;  %v1004_v41 = vmax.f32 %v992_v11, 0.0  ;;  %v2321_v50 = vmul.f32 0.001953125, %v810_v8 }
 0x357   :  { %v1019_v62 = vsub.f32 %v2037_v10, %v2303_v12  ;;  %v1024_v10 = vsub.f32 %v2067_v21, %v2309_v9 }
 0x358   :  { %v993_v36 = vsub.f32 %v969_v53, %v981_v45  ;;  %v1064_v8 = vadd.f32 1e-05, %v1004_v41  ;;  %v982_v3 = vmul.f32 %v2321_v50, %v2321_v50 }
 0x359   :  { %v815_v11 = vpop.xlane.xlu1 %814  ;;  %v918_v54 = vpop.xlane.xlu0 %917 }
 0x35a   :  { %v1005_v63 = vmax.f32 %v993_v36, 0.0  ;;  %v2337_v40 = vmul.f32 0.001953125, %v815_v11  ;;  %v970_v1 = vmul.f32 0.001953125, %v918_v54  ;;  %1572 = vrsqrt.f32 %v1064_v8 }
 0x35c   :  { %v1065_v18 = vadd.f32 1e-05, %v1005_v63  ;;  %v1569_v5 = vpop.eup %1568  ;;  %v994_v45 = vsub.f32 %v970_v1, %v982_v3  ;;  %v983_v53 = vmul.f32 %v2337_v40, %v2337_v40 }
 0x35d   :  { %v923_v41 = vpop.xlane.xlu1 %922  ;;  %v820_v25 = vpop.xlane.xlu0 %819  ;;  %v1086_v9 = vmul.f32 %v1569_v5, %v1014_v32  ;;  %v1087_v36 = vmul.f32 %v1569_v5, %v1015_v49  ;;  %v1088_v8 = vmul.f32 %v1569_v5, %v1016_v20  ;;  %v1089_v11 = vmul.f32 %v1569_v5, %v1017_v59 }
 0x35e   :  { %1574 = vrsqrt.f32 %v1065_v18  ;;  %v2357_v54 = vmax.f32 %v994_v45, 0.0  ;;  %v971_v63 = vmul.f32 0.001953125, %v923_v41  ;;  %v2359_v12 = vmul.f32 0.001953125, %v820_v25 }
 0x35f   :  { %vm1134_vm12 = vcmp.gt.f32.partialorder %v1086_v9, 0.0  ;;  %vm1135_vm13 = vcmp.gt.f32.partialorder %v1087_v36, 0.0  ;;  %vm1136_vm14 = vcmp.gt.f32.partialorder %v1088_v8, 0.0  ;;  %vm1137_vm15 = vcmp.gt.f32.partialorder %v1089_v11, 0.0 }
 0x360   :  { %v1571_v22 = vpop.eup %1570  ;;  %v1182_v1 = vmul.f32 0.01, %v1086_v9  ;;  %v1183_v3 = vmul.f32 0.01, %v1087_v36  ;;  %v1184_v21 = vmul.f32 0.01, %v1088_v8  ;;  %v995_v7 = vsub.f32 %v971_v63, %v983_v53 }
 0x361   :  { %v1090_v34 = vmul.f32 %v1571_v22, %v1018_v39  ;;  %v1185_v43 = vmul.f32 0.01, %v1089_v11  ;;  %v1091_v32 = vmul.f32 %v1571_v22, %v1019_v62  ;;  %v1092_v49 = vmul.f32 %v1571_v22, %v1020_v4 }
 0x362   :  { %v1093_v20 = vmul.f32 %v1571_v22, %v1021_v2  ;;  %v1230_v59 = vsel %vm1134_vm12, %v1086_v9, %v1182_v1  ;;  %v1231_v18 = vsel %vm1135_vm13, %v1087_v36, %v1183_v3  ;;  %v1232_v5 = vsel %vm1136_vm14, %v1088_v8, %v1184_v21 }
 0x363   :  { %vm1138_vm0 = vcmp.gt.f32.partialorder %v1090_v34, 0.0  ;;  %v1233_v45 = vsel %vm1137_vm15, %v1089_v11, %v1185_v43  ;;  %1278 = vst [vmem:[#allocation8] sm:$0xff] %v1230_v59  ;;  %1279 = vst [vmem:[#allocation8 + $0x8] sm:$0xff] %v1231_v18  ;;  %vm1139_vm1 = vcmp.gt.f32.partialorder %v1091_v32, 0.0  ;;  %vm1140_vm2 = vcmp.gt.f32.partialorder %v1092_v49, 0.0 }
 0x364   :  { %1280 = vst [vmem:[#allocation8 + $0x10] sm:$0xff] %v1232_v5  ;;  %vm1141_vm3 = vcmp.gt.f32.partialorder %v1093_v20, 0.0  ;;  %v1573_v41 = vpop.eup %1572  ;;  %1281 = vst [vmem:[#allocation8 + $0x18] sm:$0xff] %v1233_v45  ;;  %v1186_v25 = vmul.f32 0.01, %v1090_v34 }
 0x365   :  { %v1187_v61 = vmul.f32 0.01, %v1091_v32  ;;  %v1188_v39 = vmul.f32 0.01, %v1092_v49  ;;  %v1189_v62 = vmul.f32 0.01, %v1093_v20  ;;  %v1094_v4 = vmul.f32 %v1573_v41, %v1022_v57 }
 0x366   :  { %v1095_v2 = vmul.f32 %v1573_v41, %v1023_v31  ;;  %v1096_v22 = vmul.f32 %v1573_v41, %v1024_v10  ;;  %v1234_v21 = vsel %vm1138_vm0, %v1090_v34, %v1186_v25  ;;  %v1097_v36 = vmul.f32 %v1573_v41, %v1025_v6  ;;  %v825_v31 = vpop.xlane.xlu1 %824 }
 0x367   :  { %v1235_v9 = vsel %vm1139_vm1, %v1091_v32, %v1187_v61  ;;  %v1236_v43 = vsel %vm1140_vm2, %v1092_v49, %v1188_v39  ;;  %v1237_v8 = vsel %vm1141_vm3, %v1093_v20, %v1189_v62  ;;  %1282 = vst [vmem:[#allocation8 + $0x20] sm:$0xff] %v1234_v21  ;;  %vm1142_vm4 = vcmp.gt.f32.partialorder %v1094_v4, 0.0  ;;  %v928_v39 = vpop.xlane.xlu0 %927 }
 0x368   :  { %1283 = vst [vmem:[#allocation8 + $0x28] sm:$0xff] %v1235_v9  ;;  %1284 = vst [vmem:[#allocation8 + $0x30] sm:$0xff] %v1236_v43  ;;  %vm1143_vm5 = vcmp.gt.f32.partialorder %v1095_v2, 0.0  ;;  %vm1144_vm6 = vcmp.gt.f32.partialorder %v1096_v22, 0.0  ;;  %v1575_v11 = vpop.eup %1574  ;;  %vm1145_vm7 = vcmp.gt.f32.partialorder %v1097_v36, 0.0  ;;  %v1007_v57 = vmax.f32 %v995_v7, 0.0 }
 0x369   :  { %1285 = vst [vmem:[#allocation8 + $0x38] sm:$0xff] %v1237_v8  ;;  %v1190_v53 = vmul.f32 0.01, %v1094_v4  ;;  %v1191_v63 = vmul.f32 0.01, %v1095_v2  ;;  %v2503_v61 = vsub.f32 %v2075_v23, %v2311_v46  ;;  %v2504_v34 = vsub.f32 %v2083_v35, %v2311_v46 }
 0x36a   :  { %v1192_v10 = vmul.f32 0.01, %v1096_v22  ;;  %v1193_v1 = vmul.f32 0.01, %v1097_v36  ;;  %v2505_v20 = vsub.f32 %v2091_v30, %v2311_v46  ;;  %v2506_v7 = vsub.f32 %v2099_v55, %v2311_v46 }
 0x36b   :  { %v1098_v6 = vmul.f32 %v1575_v11, %v2503_v61  ;;  %v1099_v3 = vmul.f32 %v1575_v11, %v2504_v34  ;;  %v1238_v32 = vsel %vm1142_vm4, %v1094_v4, %v1190_v53  ;;  %v1239_v49 = vsel %vm1143_vm5, %v1095_v2, %v1191_v63  ;;  %v933_v4 = vpop.xlane.xlu1 %932 }
 0x36c   :  { %v1100_v59 = vmul.f32 %v1575_v11, %v2505_v20  ;;  %v1101_v18 = vmul.f32 %v1575_v11, %v2506_v7  ;;  %v1240_v5 = vsel %vm1144_vm6, %v1096_v22, %v1192_v10  ;;  %v1241_v45 = vsel %vm1145_vm7, %v1097_v36, %v1193_v1  ;;  %1286 = vst [vmem:[#allocation8 + $0x40] sm:$0xff] %v1238_v32 }
 0x36d   :  { %1287 = vst [vmem:[#allocation8 + $0x48] sm:$0xff] %v1239_v49  ;;  %vm1146_vm8 = vcmp.gt.f32.partialorder %v1098_v6, 0.0  ;;  %vm1147_vm9 = vcmp.gt.f32.partialorder %v1099_v3, 0.0  ;;  %1288 = vst [vmem:[#allocation8 + $0x50] sm:$0xff] %v1240_v5  ;;  %v1194_v23 = vmul.f32 0.01, %v1098_v6  ;;  %v984_v9 = vmul.f32 %v2359_v12, %v2359_v12 }
 0x36e   :  { %1289 = vst [vmem:[#allocation8 + $0x58] sm:$0xff] %v1241_v45  ;;  %vm1148_vm10 = vcmp.gt.f32.partialorder %v1100_v59, 0.0  ;;  %vm1149_vm11 = vcmp.gt.f32.partialorder %v1101_v18, 0.0  ;;  %v1195_v35 = vmul.f32 0.01, %v1099_v3  ;;  %v2376_v21 = vmul.f32 0.001953125, %v825_v31 }
 0x36f   :  { %v1196_v41 = vmul.f32 0.01, %v1100_v59  ;;  %v1197_v30 = vmul.f32 0.01, %v1101_v18  ;;  %v1066_v25 = vadd.f32 1e-05, %v2357_v54  ;;  %v1242_v55 = vsel %vm1146_vm8, %v1098_v6, %v1194_v23 }
 0x370   :  { %v1243_v46 = vsel %vm1147_vm9, %v1099_v3, %v1195_v35  ;;  %v1067_v62 = vadd.f32 1e-05, %v1007_v57  ;;  %1290 = vst [vmem:[#allocation8 + $0x60] sm:$0xff] %v1242_v55  ;;  %v972_v43 = vmul.f32 0.001953125, %v928_v39  ;;  %v973_v54 = vmul.f32 0.001953125, %v933_v4 }
 0x371   :  { %v1244_v2 = vsel %vm1148_vm10, %v1100_v59, %v1196_v41  ;;  %v1245_v22 = vsel %vm1149_vm11, %v1101_v18, %v1197_v30  ;;  %1291 = vst [vmem:[#allocation8 + $0x68] sm:$0xff] %v1243_v46  ;;  %1576 = vrsqrt.f32 %v1066_v25  ;;  %v985_v11 = vmul.f32 %v2376_v21, %v2376_v21 }
 0x372   :  { %1292 = vst [vmem:[#allocation8 + $0x70] sm:$0xff] %v1244_v2  ;;  %1293 = vst [vmem:[#allocation8 + $0x78] sm:$0xff] %v1245_v22  ;;  %1578 = vrsqrt.f32 %v1067_v62  ;;  %v830_v36 = vpop.xlane.xlu0 %829  ;;  %v996_v8 = vsub.f32 %v972_v43, %v984_v9  ;;  %v1030_v63 = vsub.f32 %v2102_v33, %v2321_v50  ;;  %v1031_v57 = vsub.f32 %v2105_v48, %v2321_v50 }
 0x373   :  { %v2382_v53 = vmul.f32 0.001953125, %v830_v36  ;;  %v1032_v31 = vsub.f32 %v2115_v51, %v2321_v50  ;;  %v1033_v10 = vsub.f32 %v2128_v24, %v2321_v50  ;;  %v997_v61 = vsub.f32 %v973_v54, %v985_v11 }
 0x374   :  { %v1008_v1 = vmax.f32 %v996_v8, 0.0  ;;  %v1034_v34 = vsub.f32 %v2123_v60, %v2337_v40  ;;  %v1035_v3 = vsub.f32 %v2131_v28, %v2337_v40  ;;  %v1036_v33 = vsub.f32 %v2139_v27, %v2337_v40 }
 0x375   :  { %v1037_v48 = vsub.f32 %v2147_v42, %v2337_v40  ;;  %v1009_v49 = vmax.f32 %v997_v61, 0.0  ;;  %v986_v24 = vmul.f32 %v2382_v53, %v2382_v53  ;;  %v1038_v20 = vsub.f32 %v2150_v37, %v2359_v12 }
 0x376   :  { %v938_v6 = vpop.xlane.xlu0 %937  ;;  %v835_v32 = vpop.xlane.xlu1 %834  ;;  %v1068_v51 = vadd.f32 1e-05, %v1008_v1  ;;  %v1039_v60 = vsub.f32 %v2153_v52, %v2359_v12  ;;  %v1040_v28 = vsub.f32 %v2163_v15, %v2359_v12  ;;  %v1041_v27 = vsub.f32 %v2171_v13, %v2359_v12 }
 0x377   :  { %v974_v50 = vmul.f32 0.001953125, %v938_v6  ;;  %v1069_v40 = vadd.f32 1e-05, %v1009_v49  ;;  %v2410_v59 = vmul.f32 0.001953125, %v835_v32  ;;  %v1043_v6 = vsub.f32 %v2182_v58, %v2376_v21 }
 0x378   :  { %1580 = vrsqrt.f32 %v1068_v51 }
 0x379   :  { %v998_v7 = vsub.f32 %v974_v50, %v986_v24  ;;  %1582 = vrsqrt.f32 %v1069_v40  ;;  %v987_v36 = vmul.f32 %v2410_v59, %v2410_v59 }
 0x37a   :  { %v943_v39 = vpop.xlane.xlu1 %942 }
 0x37b   :  { %v1577_v42 = vpop.eup %1576  ;;  %v1010_v54 = vmax.f32 %v998_v7, 0.0  ;;  %v975_v8 = vmul.f32 0.001953125, %v943_v39 }
 0x37c   :  { %v1579_v18 = vpop.eup %1578  ;;  %v1102_v5 = vmul.f32 %v1577_v42, %v1030_v63  ;;  %v1103_v45 = vmul.f32 %v1577_v42, %v1031_v57  ;;  %v1104_v23 = vmul.f32 %v1577_v42, %v1032_v31  ;;  %v1105_v37 = vmul.f32 %v1577_v42, %v1033_v10  ;;  %v840_v10 = vpop.xlane.xlu0 %839 }
 0x37d   :  { %v1106_v35 = vmul.f32 %v1579_v18, %v1034_v34  ;;  %v1107_v41 = vmul.f32 %v1579_v18, %v1035_v3  ;;  %v1108_v52 = vmul.f32 %v1579_v18, %v1036_v33  ;;  %v1109_v30 = vmul.f32 %v1579_v18, %v1037_v48 }
 0x37e   :  { %vm1150_vm12 = vcmp.gt.f32.partialorder %v1102_v5, 0.0  ;;  %vm1151_vm13 = vcmp.gt.f32.partialorder %v1103_v45, 0.0  ;;  %vm1152_vm14 = vcmp.gt.f32.partialorder %v1104_v23, 0.0  ;;  %vm1153_vm15 = vcmp.gt.f32.partialorder %v1105_v37, 0.0  ;;  %v845_v50 = vpop.xlane.xlu1 %844 }
 0x37f   :  { %v1198_v15 = vmul.f32 0.01, %v1102_v5  ;;  %v1199_v13 = vmul.f32 0.01, %v1103_v45  ;;  %v1200_v12 = vmul.f32 0.01, %v1104_v23  ;;  %v1042_v31 = vsub.f32 %v2174_v47, %v2376_v21 }
 0x380   :  { %v1201_v25 = vmul.f32 0.01, %v1105_v37  ;;  %vm1154_vm0 = vcmp.gt.f32.partialorder %v1106_v35, 0.0  ;;  %vm1155_vm1 = vcmp.gt.f32.partialorder %v1107_v41, 0.0  ;;  %vm1156_vm2 = vcmp.gt.f32.partialorder %v1108_v52, 0.0 }
 0x381   :  { %v1246_v55 = vsel %vm1150_vm12, %v1102_v5, %v1198_v15  ;;  %v1247_v46 = vsel %vm1151_vm13, %v1103_v45, %v1199_v13  ;;  %v1248_v62 = vsel %vm1152_vm14, %v1104_v23, %v1200_v12  ;;  %vm1157_vm3 = vcmp.gt.f32.partialorder %v1109_v30, 0.0  ;;  %v948_v13 = vpop.xlane.xlu0 %947 }
 0x382   :  { %v1249_v4 = vsel %vm1153_vm15, %v1105_v37, %v1201_v25  ;;  %1294 = vst [vmem:[#allocation8 + $0x80] sm:$0xff] %v1246_v55  ;;  %1295 = vst [vmem:[#allocation8 + $0x88] sm:$0xff] %v1247_v46  ;;  %v1202_v2 = vmul.f32 0.01, %v1106_v35  ;;  %v1203_v22 = vmul.f32 0.01, %v1107_v41  ;;  %v1581_v1 = vpop.eup %1580  ;;  %v999_v3 = vsub.f32 %v975_v8, %v987_v36  ;;  %v953_v12 = vpop.xlane.xlu1 %952 }
 0x383   :  { %1296 = vst [vmem:[#allocation8 + $0x90] sm:$0xff] %v1248_v62  ;;  %v1204_v9 = vmul.f32 0.01, %v1108_v52  ;;  %1297 = vst [vmem:[#allocation8 + $0x98] sm:$0xff] %v1249_v4  ;;  %v1205_v43 = vmul.f32 0.01, %v1109_v30  ;;  %v1110_v33 = vmul.f32 %v1581_v1, %v1038_v20  ;;  %v1111_v48 = vmul.f32 %v1581_v1, %v1039_v60  ;;  %v1583_v58 = vpop.eup %1582 }
 0x384   :  { %v1250_v11 = vsel %vm1154_vm0, %v1106_v35, %v1202_v2  ;;  %v1251_v63 = vsel %vm1155_vm1, %v1107_v41, %v1203_v22  ;;  %v1070_v34 = vadd.f32 1e-05, %v1010_v54  ;;  %v1112_v32 = vmul.f32 %v1581_v1, %v1040_v28 }
 0x385   :  { %v1252_v57 = vsel %vm1156_vm2, %v1108_v52, %v1204_v9  ;;  %v1253_v61 = vsel %vm1157_vm3, %v1109_v30, %v1205_v43  ;;  %1298 = vst [vmem:[#allocation8 + $0xa0] sm:$0xff] %v1250_v11  ;;  %1299 = vst [vmem:[#allocation8 + $0xa8] sm:$0xff] %v1251_v63  ;;  %v1113_v51 = vmul.f32 %v1581_v1, %v1041_v27  ;;  %v1011_v49 = vmax.f32 %v999_v3, 0.0 }
 0x386   :  { %1300 = vst [vmem:[#allocation8 + $0xb0] sm:$0xff] %v1252_v57  ;;  %1301 = vst [vmem:[#allocation8 + $0xb8] sm:$0xff] %v1253_v61  ;;  %v1044_v47 = vsub.f32 %v2179_v14, %v2376_v21  ;;  %1584 = vrsqrt.f32 %v1070_v34  ;;  %v2424_v24 = vmul.f32 0.001953125, %v840_v10  ;;  %vm1158_vm4 = vcmp.gt.f32.partialorder %v1110_v33, 0.0 }
 0x387   :  { %vm1159_vm5 = vcmp.gt.f32.partialorder %v1111_v48, 0.0  ;;  %vm1160_vm6 = vcmp.gt.f32.partialorder %v1112_v32, 0.0  ;;  %vm1161_vm7 = vcmp.gt.f32.partialorder %v1113_v51, 0.0  ;;  %v1045_v42 = vsub.f32 %v2195_v0, %v2376_v21 }
 0x388   :  { %v1206_v20 = vmul.f32 0.01, %v1110_v33  ;;  %v1207_v60 = vmul.f32 0.01, %v1111_v48  ;;  %v1208_v28 = vmul.f32 0.01, %v1112_v32  ;;  %v1114_v40 = vmul.f32 %v1583_v58, %v1042_v31 }
 0x389   :  { %v1209_v27 = vmul.f32 0.01, %v1113_v51  ;;  %v1115_v7 = vmul.f32 %v1583_v58, %v1043_v6  ;;  %v1116_v14 = vmul.f32 %v1583_v58, %v1044_v47  ;;  %v1117_v23 = vmul.f32 %v1583_v58, %v1045_v42 }
 0x38a   :  { %v1254_v18 = vsel %vm1158_vm4, %v1110_v33, %v1206_v20  ;;  %v1255_v5 = vsel %vm1159_vm5, %v1111_v48, %v1207_v60  ;;  %v1256_v45 = vsel %vm1160_vm6, %v1112_v32, %v1208_v28  ;;  %vm1162_vm8 = vcmp.gt.f32.partialorder %v1114_v40, 0.0 }
 0x38b   :  { %v1257_v37 = vsel %vm1161_vm7, %v1113_v51, %v1209_v27  ;;  %1302 = vst [vmem:[#allocation8 + $0xc0] sm:$0xff] %v1254_v18  ;;  %1303 = vst [vmem:[#allocation8 + $0xc8] sm:$0xff] %v1255_v5  ;;  %vm1163_vm9 = vcmp.gt.f32.partialorder %v1115_v7, 0.0  ;;  %v2428_v35 = vmul.f32 0.001953125, %v845_v50  ;;  %vm1164_vm10 = vcmp.gt.f32.partialorder %v1116_v14, 0.0  ;;  %v2507_v51 = vld [vmem:[#allocation12_spill] sm:$0xff] }
 0x38c   :  { %1304 = vst [vmem:[#allocation8 + $0xd0] sm:$0xff] %v1256_v45  ;;  %1305 = vst [vmem:[#allocation8 + $0xd8] sm:$0xff] %v1257_v37  ;;  %vm1165_vm11 = vcmp.gt.f32.partialorder %v1117_v23, 0.0  ;;  %v1210_v0 = vmul.f32 0.01, %v1114_v40  ;;  %v1046_v30 = vsub.f32 %v2206_v16, %v2382_v53  ;;  %v1047_v55 = vsub.f32 %v2209_v19, %v2382_v53  ;;  %v2508_v5 = vld [vmem:[#allocation13_spill] sm:$0xff] }
 0x38d   :  { %v1211_v21 = vmul.f32 0.01, %v1115_v7  ;;  %v1212_v41 = vmul.f32 0.01, %v1116_v14  ;;  %v1213_v52 = vmul.f32 0.01, %v1117_v23  ;;  %v1048_v46 = vsub.f32 %v2224_v29, %v2382_v53 }
 0x38e   :  { %v1071_v15 = vadd.f32 1e-05, %v1011_v49  ;;  %v1258_v25 = vsel %vm1162_vm8, %v1114_v40, %v1210_v0  ;;  %v1049_v2 = vsub.f32 %v2233_v38, %v2382_v53  ;;  %v988_v22 = vmul.f32 %v2424_v24, %v2424_v24  ;;  %v2510_v0 = vld [vmem:[#allocation17_spill] sm:$0xff] }
 0x38f   :  { %v1259_v39 = vsel %vm1163_vm9, %v1115_v7, %v1211_v21  ;;  %v1260_v62 = vsel %vm1164_vm10, %v1116_v14, %v1212_v41  ;;  %v1261_v4 = vsel %vm1165_vm11, %v1117_v23, %v1213_v52  ;;  %1306 = vst [vmem:[#allocation8 + $0xe0] sm:$0xff] %v1258_v25  ;;  %v976_v9 = vmul.f32 0.001953125, %v948_v13  ;;  %v2509_v23 = vld [vmem:[#allocation16_spill] sm:$0xff]  ;;  %v2511_v25 = vld [vmem:[#allocation14_spill] sm:$0xff] }
 0x390   :  { %1307 = vst [vmem:[#allocation8 + $0xe8] sm:$0xff] %v1259_v39  ;;  %1586 = vrsqrt.f32 %v1071_v15  ;;  %v1585_v16 = vpop.eup %1584  ;;  %1308 = vst [vmem:[#allocation8 + $0xf0] sm:$0xff] %v1260_v62  ;;  %v989_v19 = vmul.f32 %v2428_v35, %v2428_v35  ;;  %v977_v43 = vmul.f32 0.001953125, %v953_v12  ;;  %v1050_v32 = vsub.f32 %v2216_v26, %v2410_v59 }
 0x391   :  { %1309 = vst [vmem:[#allocation8 + $0xf8] sm:$0xff] %v1261_v4  ;;  %v1118_v29 = vmul.f32 %v1585_v16, %v1046_v30  ;;  %v1119_v54 = vmul.f32 %v1585_v16, %v1047_v55  ;;  %v1120_v36 = vmul.f32 %v1585_v16, %v1048_v46  ;;  %v1121_v8 = vmul.f32 %v1585_v16, %v1049_v2  ;;  %v2513_v46 = vld [vmem:[#allocation18_spill] sm:$0xff]  ;;  %v2514_v4 = vld [vmem:[#allocation19_spill] sm:$0xff] }
 0x392   :  { %v1000_v11 = vsub.f32 %v976_v9, %v988_v22  ;;  %v1001_v63 = vsub.f32 %v977_v43, %v989_v19  ;;  %v1051_v47 = vsub.f32 %v2507_v51, %v2410_v59  ;;  %v1052_v49 = vsub.f32 %v2245_v56, %v2410_v59 }
 0x393   :  { %vm1166_vm12 = vcmp.gt.f32.partialorder %v1118_v29, 0.0  ;;  %vm1167_vm13 = vcmp.gt.f32.partialorder %v1119_v54, 0.0  ;;  %vm1168_vm14 = vcmp.gt.f32.partialorder %v1120_v36, 0.0  ;;  %vm1169_vm15 = vcmp.gt.f32.partialorder %v1121_v8, 0.0 }
 0x394   :  { %v1214_v38 = vmul.f32 0.01, %v1118_v29  ;;  %v1215_v53 = vmul.f32 0.01, %v1119_v54  ;;  %v1216_v57 = vmul.f32 0.01, %v1120_v36  ;;  %v1053_v50 = vsub.f32 %v2258_v44, %v2410_v59 }
 0x395   :  { %v1217_v31 = vmul.f32 0.01, %v1121_v8  ;;  %v1012_v10 = vmax.f32 %v1000_v11, 0.0  ;;  %v1013_v1 = vmax.f32 %v1001_v63, 0.0  ;;  %v1054_v59 = vsub.f32 %v2227_v17, %v2424_v24  ;;  %v2512_v17 = vld [vmem:[#allocation15_spill] sm:$0xff] }
 0x396   :  { %v1262_v61 = vsel %vm1166_vm12, %v1118_v29, %v1214_v38  ;;  %v1263_v6 = vsel %vm1167_vm13, %v1119_v54, %v1215_v53  ;;  %v1264_v34 = vsel %vm1168_vm14, %v1120_v36, %v1216_v57  ;;  %v1055_v45 = vsub.f32 %v2508_v5, %v2424_v24 }
 0x397   :  { %v1265_v3 = vsel %vm1169_vm15, %v1121_v8, %v1217_v31  ;;  %1310 = vst [vmem:[#allocation8 + $0x100] sm:$0xff] %v1262_v61  ;;  %1311 = vst [vmem:[#allocation8 + $0x108] sm:$0xff] %v1263_v6  ;;  %v1072_v33 = vadd.f32 1e-05, %v1012_v10  ;;  %v1073_v48 = vadd.f32 1e-05, %v1013_v1  ;;  %v1056_v37 = vsub.f32 %v2509_v23, %v2424_v24 }
 0x398   :  { %1312 = vst [vmem:[#allocation8 + $0x110] sm:$0xff] %v1264_v34  ;;  %1313 = vst [vmem:[#allocation8 + $0x118] sm:$0xff] %v1265_v3  ;;  %v1057_v21 = vsub.f32 %v2510_v0, %v2424_v24  ;;  %v1058_v39 = vsub.f32 %v2511_v25, %v2428_v35  ;;  %v1059_v55 = vsub.f32 %v2512_v17, %v2428_v35 }
 0x399   :  { %1588 = vrsqrt.f32 %v1072_v33  ;;  %v1060_v62 = vsub.f32 %v2513_v46, %v2428_v35  ;;  %v1061_v2 = vsub.f32 %v2514_v4, %v2428_v35 }
 0x39a   :  { %v1587_v58 = vpop.eup %1586  ;;  %1590 = vrsqrt.f32 %v1073_v48 }
 0x39b   :  { %v1122_v42 = vmul.f32 %v1587_v58, %v1050_v32  ;;  %v1123_v20 = vmul.f32 %v1587_v58, %v1051_v47  ;;  %v1124_v60 = vmul.f32 %v1587_v58, %v1052_v49  ;;  %v1125_v28 = vmul.f32 %v1587_v58, %v1053_v50 }
 0x39d   :  { %vm1170_vm0 = vcmp.gt.f32.partialorder %v1122_v42, 0.0  ;;  %vm1171_vm1 = vcmp.gt.f32.partialorder %v1123_v20, 0.0  ;;  %vm1172_vm2 = vcmp.gt.f32.partialorder %v1124_v60, 0.0  ;;  %vm1173_vm3 = vcmp.gt.f32.partialorder %v1125_v28, 0.0 }
 0x39e   :  { %v1218_v26 = vmul.f32 0.01, %v1122_v42  ;;  %v1219_v27 = vmul.f32 0.01, %v1123_v20  ;;  %v1220_v40 = vmul.f32 0.01, %v1124_v60 }
 0x39f   :  { %v1221_v7 = vmul.f32 0.01, %v1125_v28 }
 0x3a0   :  { %v1266_v56 = vsel %vm1170_vm0, %v1122_v42, %v1218_v26  ;;  %v1267_v14 = vsel %vm1171_vm1, %v1123_v20, %v1219_v27  ;;  %v1268_v18 = vsel %vm1172_vm2, %v1124_v60, %v1220_v40 }
 0x3a1   :  { %v1269_v44 = vsel %vm1173_vm3, %v1125_v28, %v1221_v7  ;;  %1314 = vst [vmem:[#allocation8 + $0x120] sm:$0xff] %v1266_v56  ;;  %1315 = vst [vmem:[#allocation8 + $0x128] sm:$0xff] %v1267_v14 }
 0x3a2   :  { %1316 = vst [vmem:[#allocation8 + $0x130] sm:$0xff] %v1268_v18  ;;  %1317 = vst [vmem:[#allocation8 + $0x138] sm:$0xff] %v1269_v44 }
 0x3a3   :  { %v1589_v41 = vpop.eup %1588 }
 0x3a4   :  { %v1126_v52 = vmul.f32 %v1589_v41, %v1054_v59  ;;  %v1127_v30 = vmul.f32 %v1589_v41, %v1055_v45  ;;  %v1128_v15 = vmul.f32 %v1589_v41, %v1056_v37  ;;  %v1129_v13 = vmul.f32 %v1589_v41, %v1057_v21  ;;  %v1591_v12 = vpop.eup %1590 }
 0x3a5   :  { %v1130_v9 = vmul.f32 %v1591_v12, %v1058_v39  ;;  %v1131_v43 = vmul.f32 %v1591_v12, %v1059_v55  ;;  %v1132_v29 = vmul.f32 %v1591_v12, %v1060_v62  ;;  %v1133_v54 = vmul.f32 %v1591_v12, %v1061_v2 }
 0x3a6   :  { %vm1174_vm4 = vcmp.gt.f32.partialorder %v1126_v52, 0.0  ;;  %vm1175_vm5 = vcmp.gt.f32.partialorder %v1127_v30, 0.0  ;;  %vm1176_vm6 = vcmp.gt.f32.partialorder %v1128_v15, 0.0  ;;  %vm1177_vm7 = vcmp.gt.f32.partialorder %v1129_v13, 0.0 }
 0x3a7   :  { %v1222_v24 = vmul.f32 0.01, %v1126_v52  ;;  %v1223_v16 = vmul.f32 0.01, %v1127_v30  ;;  %v1224_v22 = vmul.f32 0.01, %v1128_v15 }
 0x3a8   :  { %v1225_v19 = vmul.f32 0.01, %v1129_v13  ;;  %vm1178_vm8 = vcmp.gt.f32.partialorder %v1130_v9, 0.0  ;;  %vm1179_vm9 = vcmp.gt.f32.partialorder %v1131_v43, 0.0  ;;  %vm1180_vm10 = vcmp.gt.f32.partialorder %v1132_v29, 0.0 }
 0x3a9   :  { %v1270_v36 = vsel %vm1174_vm4, %v1126_v52, %v1222_v24  ;;  %v1271_v8 = vsel %vm1175_vm5, %v1127_v30, %v1223_v16  ;;  %v1272_v11 = vsel %vm1176_vm6, %v1128_v15, %v1224_v22  ;;  %vm1181_vm11 = vcmp.gt.f32.partialorder %v1133_v54, 0.0 }
 0x3aa   :  { %v1273_v63 = vsel %vm1177_vm7, %v1129_v13, %v1225_v19  ;;  %1318 = vst [vmem:[#allocation8 + $0x140] sm:$0xff] %v1270_v36  ;;  %1319 = vst [vmem:[#allocation8 + $0x148] sm:$0xff] %v1271_v8  ;;  %v1226_v35 = vmul.f32 0.01, %v1130_v9  ;;  %v1227_v38 = vmul.f32 0.01, %v1131_v43 }
 0x3ab   :  { %1320 = vst [vmem:[#allocation8 + $0x150] sm:$0xff] %v1272_v11  ;;  %1321 = vst [vmem:[#allocation8 + $0x158] sm:$0xff] %v1273_v63  ;;  %v1228_v53 = vmul.f32 0.01, %v1132_v29  ;;  %v1229_v57 = vmul.f32 0.01, %v1133_v54 }
 0x3ac   :  { %v1274_v31 = vsel %vm1178_vm8, %v1130_v9, %v1226_v35  ;;  %v1275_v10 = vsel %vm1179_vm9, %v1131_v43, %v1227_v38 }
 0x3ad   :  { %v1276_v1 = vsel %vm1180_vm10, %v1132_v29, %v1228_v53  ;;  %v1277_v61 = vsel %vm1181_vm11, %v1133_v54, %v1229_v57  ;;  %1322 = vst [vmem:[#allocation8 + $0x160] sm:$0xff] %v1274_v31  ;;  %1323 = vst [vmem:[#allocation8 + $0x168] sm:$0xff] %v1275_v10 }
 0x3ae   :  { %1324 = vst [vmem:[#allocation8 + $0x170] sm:$0xff] %v1276_v1  ;;  %1325 = vst [vmem:[#allocation8 + $0x178] sm:$0xff] %v1277_v61 }
 0x3af   :  { %1669 = shalt.err (!%p1666_p0)
}
 0x3b0   :  { %s1670_s12 = scalar_lea.hbm %s2486_s5, 6144 }
 0x3b1   :  { %p1671_p1 = scmp.ne.s32.totalorder %s2486_s5, %s1670_s12  ;;  %p1674_p2 = scmp.lt.u32.totalorder %s1670_s12, %s2486_s5 }
 0x3b3   :  { %p1676_p3 = pnand %p1674_p2, %p1671_p1 }
 0x3b5   :  { %1679 = shalt.err (!%p1676_p3)
}
 0x3b6   :  { %1337 = dma.vmem_to_hbm [thread:$0]  %s1332_s8, 6144, %s2486_s5, [#allocation4], %s1691_s0, %s1691_s0, %s1692_s21  }
 0x3b7   :  { %1684 = dma.done.wait [#allocation4], 6144  }
 0x3b8   :  { %1685 = vsyncadd [#allocation4], 4294961152 }
 0x3b9   :  { %1341 = vsyncpa [#allocation3], 1 }
 0x3ba   :  { %1342 = vsyncpa [#allocation6], 1 }
 0x3bb   :  { %1343 = vsyncpa [#allocation4], 1 }

</bundles_post_ra>
